<compile_context>
chip_gen: v7x
topology: tpu7x:2x2x1
jax: 0.10.0
libtpu: 0.0.40
codegen_flags: <defaults>
</compile_context>

<pallas_src>
import functools

import jax
import jax.numpy as jnp
from jax.experimental import pallas as pl
from jax.experimental.pallas import tpu as pltpu


# -------------------- generation-dependent tiling constants ------------------

def _vmem_capacity_bytes():
    try:
        return int(pltpu.get_tpu_info().vmem_capacity_bytes)
    except Exception:
        return 64 * 1024 * 1024          # assume v7x-class if query fails


_VMEM_CAP = _vmem_capacity_bytes()
if _VMEM_CAP >= 96 * 1024 * 1024:        # v5e / v6e: 128 MiB VMEM per core
    _VMEM_LIMIT = 100 * 1024 * 1024
    _TM, _TN, _TK = 512, 1024, 1024
else:                                    # v7x: 64 MiB VMEM per core
    _VMEM_LIMIT = 40 * 1024 * 1024
    _TM, _TN, _TK = 256, 512, 512


def _pick_tile(dim, target, align):
    """Largest tile <= target evenly dividing dim, preferring multiples of 256
    (full MXU width on v6e/v7x), then `align`; else the full dim."""
    if dim <= target:
        return dim
    for a in (256, align):
        if a > target:
            continue
        t = (target // a) * a
        while t >= a:
            if dim % t == 0:
                return t
            t -= a
    return dim


# --------------------------- tiled matmul kernel -----------------------------
# out = [residual +] (x @ w)   with f32 VMEM accumulator over the K grid axis.

def _matmul_kernel(*refs, has_residual):
    x_ref, w_ref = refs[0], refs[1]
    if has_residual:
        res_ref, o_ref, acc_ref = refs[2], refs[3], refs[4]
    else:
        res_ref, o_ref, acc_ref = None, refs[2], refs[3]

    @pl.when(pl.program_id(2) == 0)
    def _():
        acc_ref[...] = jnp.zeros_like(acc_ref)

    acc_ref[...] += jnp.dot(x_ref[...], w_ref[...],
                            preferred_element_type=jnp.float32)

    @pl.when(pl.program_id(2) == pl.num_programs(2) - 1)
    def _():
        acc = acc_ref[...]
        if has_residual:
            acc = acc + res_ref[...].astype(jnp.float32)
        o_ref[...] = acc.astype(o_ref.dtype)


def matmul(x, w, residual=None):
    """x: (M, K) @ w: (K, N) -> (M, N), tiled & pipelined, optional fused residual."""
    M, K = x.shape
    _, N = w.shape
    tm = _pick_tile(M, _TM, 8)
    tn = _pick_tile(N, _TN, 128)
    tk = _pick_tile(K, _TK, 128)
    has_res = residual is not None

    kern = functools.partial(_matmul_kernel, has_residual=has_res)
    in_specs = [pl.BlockSpec((tm, tk), lambda i, j, k: (i, k)),
                pl.BlockSpec((tk, tn), lambda i, j, k: (k, j))]
    args = [x, w]
    if has_res:
        # Residual block index is constant across k and only read at finalize:
        # single-buffer it to free VMEM for the main tiles.
        in_specs.append(pl.BlockSpec((tm, tn), lambda i, j, k: (i, j),
                                     pipeline_mode=pl.Buffered(1)))
        args.append(residual)

    return pl.pallas_call(
        kern,
        grid=(M // tm, N // tn, K // tk),
        out_shape=jax.ShapeDtypeStruct((M, N), x.dtype),
        in_specs=in_specs,
        out_specs=pl.BlockSpec((tm, tn), lambda i, j, k: (i, j)),
        scratch_shapes=[pltpu.VMEM((tm, tn), jnp.float32)],
        compiler_params=pltpu.CompilerParams(
            dimension_semantics=("parallel", "parallel", "arbitrary"),
            vmem_limit_bytes=_VMEM_LIMIT),
    )(*args)


# ---------------------- fused LayerNorm + matmul kernel ----------------------
# out = LN(x) @ w.  LayerNorm is computed ONCE per row tile (j == 0) into a
# VMEM scratch in the weight dtype and reused for every N tile.

def _ln_linear_kernel(x_ref, g_ref, b_ref, w_ref, o_ref, xn_ref, *, eps):
    @pl.when(pl.program_id(1) == 0)
    def _():
        x = x_ref[...].astype(jnp.float32)
        mean = jnp.mean(x, axis=-1, keepdims=True)
        var = jnp.mean(jnp.square(x - mean), axis=-1, keepdims=True)
        xn = (x - mean) * jax.lax.rsqrt(var + eps)
        xn = xn * g_ref[...].astype(jnp.float32) + b_ref[...].astype(jnp.float32)
        xn_ref[...] = xn.astype(xn_ref.dtype)          # bf16 rows for the MXU

    acc = jnp.dot(xn_ref[...], w_ref[...], preferred_element_type=jnp.float32)
    o_ref[...] = acc.astype(o_ref.dtype)


def ln_linear(x, gamma, beta, w, eps=1e-5):
    M, K = x.shape
    _, N = w.shape
    tm = _pick_tile(M, _TM, 8)
    tn = _pick_tile(N, _TN, 128)
    # TODO(synk): tile K with a two-pass LN (stats pass + matmul pass) for
    # d_model large enough that (tm, K) + (K, tn) double-buffered won't fit.
    kern = functools.partial(_ln_linear_kernel, eps=eps)
    return pl.pallas_call(
        kern,
        grid=(M // tm, N // tn),
        out_shape=jax.ShapeDtypeStruct((M, N), x.dtype),
        in_specs=[pl.BlockSpec((tm, K), lambda i, j: (i, 0)),
                  pl.BlockSpec((1, K), lambda i, j: (0, 0)),
                  pl.BlockSpec((1, K), lambda i, j: (0, 0)),
                  pl.BlockSpec((K, tn), lambda i, j: (0, j))],
        out_specs=pl.BlockSpec((tm, tn), lambda i, j: (i, j)),
        scratch_shapes=[pltpu.VMEM((tm, K), w.dtype)],
        compiler_params=pltpu.CompilerParams(
            dimension_semantics=("parallel", "arbitrary"),
            vmem_limit_bytes=_VMEM_LIMIT),
    )(x, gamma.reshape(1, K), beta.reshape(1, K), w)


# ------------------------------ fused FFN kernel ------------------------------
# out = x + ( relu(LN(x) @ w1 + b1) @ w2 + b2 ),  hidden (4*D) tiled on the
# grid, the (tm, th) ReLU activation never leaves VMEM.

def _ffn_kernel(x_ref, g_ref, b_ref, w1_ref, b1_ref, w2_ref, b2_ref, o_ref,
                xn_ref, acc_ref, *, eps):
    h = pl.program_id(1)

    @pl.when(h == 0)
    def _():
        x = x_ref[...].astype(jnp.float32)
        mean = jnp.mean(x, axis=-1, keepdims=True)
        var = jnp.mean(jnp.square(x - mean), axis=-1, keepdims=True)
        xn = (x - mean) * jax.lax.rsqrt(var + eps)
        xn = xn * g_ref[...].astype(jnp.float32) + b_ref[...].astype(jnp.float32)
        xn_ref[...] = xn.astype(xn_ref.dtype)
        acc_ref[...] = jnp.zeros_like(acc_ref)

    a = jnp.dot(xn_ref[...], w1_ref[...], preferred_element_type=jnp.float32)
    a = jnp.maximum(a + b1_ref[...].astype(jnp.float32), 0.0)
    acc_ref[...] += jnp.dot(a.astype(w2_ref.dtype), w2_ref[...],
                            preferred_element_type=jnp.float32)

    @pl.when(h == pl.num_programs(1) - 1)
    def _():
        out = (acc_ref[...] + b2_ref[...].astype(jnp.float32)
               + x_ref[...].astype(jnp.float32))            # fused residual
        o_ref[...] = out.astype(o_ref.dtype)


def ffn(x, gamma, beta, w1, b1, w2, b2, eps=1e-5):
    M, D = x.shape
    H = w1.shape[1]
    tm = _pick_tile(M, _TM, 8)
    th = _pick_tile(H, _TK, 128)
    kern = functools.partial(_ffn_kernel, eps=eps)
    return pl.pallas_call(
        kern,
        grid=(M // tm, H // th),
        out_shape=jax.ShapeDtypeStruct((M, D), x.dtype),
        in_specs=[pl.BlockSpec((tm, D), lambda i, h: (i, 0)),
                  pl.BlockSpec((1, D), lambda i, h: (0, 0)),
                  pl.BlockSpec((1, D), lambda i, h: (0, 0)),
                  pl.BlockSpec((D, th), lambda i, h: (0, h)),
                  pl.BlockSpec((1, th), lambda i, h: (0, h)),
                  pl.BlockSpec((th, D), lambda i, h: (h, 0)),
                  pl.BlockSpec((1, D), lambda i, h: (0, 0))],
        out_specs=pl.BlockSpec((tm, D), lambda i, h: (i, 0)),
        scratch_shapes=[pltpu.VMEM((tm, D), w1.dtype),      # normalized rows
                        pltpu.VMEM((tm, D), jnp.float32)],  # f32 accumulator
        compiler_params=pltpu.CompilerParams(
            dimension_semantics=("parallel", "arbitrary"),
            vmem_limit_bytes=_VMEM_LIMIT),
    )(x, gamma.reshape(1, D), beta.reshape(1, D),
      w1, b1.reshape(1, H), w2, b2.reshape(1, D))


# ------------------------ standalone LayerNorm (tiled) -----------------------
# Only needed for the is_first branch, where the post-LN tensor is the residual.

def _layernorm_kernel(x_ref, g_ref, b_ref, o_ref, *, eps):
    x = x_ref[...].astype(jnp.float32)
    mean = jnp.mean(x, axis=-1, keepdims=True)
    var = jnp.mean(jnp.square(x - mean), axis=-1, keepdims=True)
    y = (x - mean) * jax.lax.rsqrt(var + eps)
    o_ref[...] = (y * g_ref[...].astype(jnp.float32)
                  + b_ref[...].astype(jnp.float32)).astype(o_ref.dtype)


def layernorm(x, gamma, beta, eps=1e-5):
    M, D = x.shape
    tm = _pick_tile(M, _TM, 8)
    return pl.pallas_call(
        functools.partial(_layernorm_kernel, eps=eps),
        grid=(M // tm,),
        out_shape=jax.ShapeDtypeStruct((M, D), x.dtype),
        in_specs=[pl.BlockSpec((tm, D), lambda i: (i, 0)),
                  pl.BlockSpec((1, D), lambda i: (0, 0)),
                  pl.BlockSpec((1, D), lambda i: (0, 0))],
        out_specs=pl.BlockSpec((tm, D), lambda i: (i, 0)),
        compiler_params=pltpu.CompilerParams(
            dimension_semantics=("parallel",),
            vmem_limit_bytes=_VMEM_LIMIT),
    )(x, gamma.reshape(1, D), beta.reshape(1, D))


# ------------------------------ attention kernel -----------------------------
# One grid step per (batch, query tile).  Q/K/V arrive as separate lane-aligned
# (.., D) blocks (the packed QKV / KV arrays are passed multiple times with
# shifted block indices).  Heads are processed in an in-kernel loop with
# per-head output stores; softmax normalization happens after PV; the
# 1/sqrt(head_dim) scale is folded into Wq at init.
# TODO(synk): add a KV grid axis + online-softmax scratch (flash style) and
# causal block skipping for very long sequences (K/V here are whole-S blocks).

def _mha_kernel(q_ref, k_ref, v_ref, o_ref, *, num_heads, causal, q_tile):
    q = q_ref[0]                                   # (tq, D)  bf16
    k = k_ref[0]                                   # (S,  D)  bf16
    v = v_ref[0]                                   # (S,  D)  bf16
    tq, D = q.shape
    S = k.shape[0]
    hd = D // num_heads

    if causal:
        row = (jax.lax.broadcasted_iota(jnp.int32, (tq, S), 0)
               + pl.program_id(1) * q_tile)
        col = jax.lax.broadcasted_iota(jnp.int32, (tq, S), 1)
        neg = jnp.where(col > row, -jnp.inf, 0.0).astype(jnp.float32)

    dn = (((1,), (1,)), ((), ()))                  # q @ k^T without a transpose
    for h in range(num_heads):
        sl = slice(h * hd, (h + 1) * hd)
        s = jax.lax.dot_general(q[:, sl], k[:, sl], dn,
                                preferred_element_type=jnp.float32)
        if causal:
            s = s + neg
        m = jnp.max(s, axis=-1, keepdims=True)
        p = jnp.exp(s - m)
        denom = jnp.sum(p, axis=-1, keepdims=True)
        oh = jnp.dot(p.astype(v.dtype), v[:, sl],
                     preferred_element_type=jnp.float32)
        oh = oh * pl.reciprocal(denom, approx=True)          # normalize post-PV
        o_ref[0, :, sl] = oh.astype(o_ref.dtype)             # per-head store


def self_attention(qkv, *, num_heads, d_model, causal):
    """qkv: (B, T, 3*D) packed Q|K|V -> (B, T, D)."""
    B, T, _ = qkv.shape
    tq = _pick_tile(T, 256, 8)
    kern = functools.partial(_mha_kernel, num_heads=num_heads,
                             causal=causal, q_tile=tq)
    return pl.pallas_call(
        kern,
        grid=(B, T // tq),
        out_shape=jax.ShapeDtypeStruct((B, T, d_model), qkv.dtype),
        in_specs=[pl.BlockSpec((1, tq, d_model), lambda b, qi: (b, qi, 0)),
                  pl.BlockSpec((1, T, d_model), lambda b, qi: (b, 0, 1)),
                  pl.BlockSpec((1, T, d_model), lambda b, qi: (b, 0, 2))],
        out_specs=pl.BlockSpec((1, tq, d_model), lambda b, qi: (b, qi, 0)),
        compiler_params=pltpu.CompilerParams(
            dimension_semantics=("parallel", "parallel"),
            vmem_limit_bytes=_VMEM_LIMIT),
    )(qkv, qkv, qkv)


def cross_attention(q, kv, *, num_heads, d_model):
    """q: (B, T, D); kv: (B, S, 2*D) packed K|V -> (B, T, D)."""
    B, T, _ = q.shape
    S = kv.shape[1]
    tq = _pick_tile(T, 256, 8)
    kern = functools.partial(_mha_kernel, num_heads=num_heads,
                             causal=False, q_tile=tq)
    return pl.pallas_call(
        kern,
        grid=(B, T // tq),
        out_shape=jax.ShapeDtypeStruct((B, T, d_model), q.dtype),
        in_specs=[pl.BlockSpec((1, tq, d_model), lambda b, qi: (b, qi, 0)),
                  pl.BlockSpec((1, S, d_model), lambda b, qi: (b, 0, 0)),
                  pl.BlockSpec((1, S, d_model), lambda b, qi: (b, 0, 1))],
        out_specs=pl.BlockSpec((1, tq, d_model), lambda b, qi: (b, qi, 0)),
        compiler_params=pltpu.CompilerParams(
            dimension_semantics=("parallel", "parallel"),
            vmem_limit_bytes=_VMEM_LIMIT),
    )(q, kv, kv)


# ----------------------------- model wrapper ---------------------------------

def transformer_decoder_block(params, x, encoder_output, *, num_heads,
                              num_cross_heads=None, causal_mask=True,
                              is_first=False):
    if num_cross_heads is None:
        num_cross_heads = num_heads
    B, T, D = x.shape
    S = encoder_output.shape[1]
    x2d = x.reshape(B * T, D)
    enc2d = encoder_output.reshape(B * S, D)

    # --- self-attention sub-block (pre-LN) ---
    if is_first:
        # Matches PyTorch: when is_first, the residual is the *post-LN* tensor.
        xn2d = layernorm(x2d, params['ln1_g'], params['ln1_b'])
        qkv = matmul(xn2d, params['sa_wqkv'])                       # (B*T, 3D)
        residual2d = xn2d
    else:
        qkv = ln_linear(x2d, params['ln1_g'], params['ln1_b'],
                        params['sa_wqkv'])                          # fused LN + QKV
        residual2d = x2d
    sa = self_attention(qkv.reshape(B, T, 3 * D), num_heads=num_heads,
                        d_model=D, causal=causal_mask)              # (B, T, D)
    h2d = matmul(sa.reshape(B * T, D), params['sa_wo'],
                 residual=residual2d)                               # fused residual

    # --- encoder-decoder (cross) attention sub-block ---
    q = ln_linear(h2d, params['ln2_g'], params['ln2_b'],
                  params['ca_wq']).reshape(B, T, D)                 # fused LN + Q
    kv = matmul(enc2d, params['ca_wkv']).reshape(B, S, 2 * D)       # fused K|V
    ca = cross_attention(q, kv, num_heads=num_cross_heads, d_model=D)
    h2d = matmul(ca.reshape(B * T, D), params['ca_wo'],
                 residual=h2d)                                      # fused residual

    # --- FFN sub-block: single fused kernel (LN+W1+b1+ReLU+W2+b2+residual) ---
    out2d = ffn(h2d, params['ln3_g'], params['ln3_b'],
                params['ffn_w1'], params['ffn_b1'],
                params['ffn_w2'], params['ffn_b2'])
    return out2d.reshape(B, T, D)


def init_params(key, d_model, num_heads, num_cross_heads=None,
                dtype=jnp.bfloat16):
    if num_cross_heads is None:
        num_cross_heads = num_heads
    assert d_model % num_heads == 0 and d_model % num_cross_heads == 0
    D = d_model
    keys = jax.random.split(key, 7)

    def w(k, fan_in, fan_out):
        scale = (2.0 / (fan_in + fan_out)) ** 0.5
        return jax.random.normal(k, (fan_in, fan_out), jnp.float32) * scale

    # Fold the 1/sqrt(head_dim) attention scale into the Q projection columns
    # (the attention kernels assume pre-scaled Q).
    wqkv = w(keys[0], D, 3 * D)
    wqkv = wqkv.at[:, :D].multiply((D // num_heads) ** (-0.5))
    wq_cross = w(keys[2], D, D) * ((D // num_cross_heads) ** (-0.5))

    p = {
        'ln1_g': jnp.ones((D,), jnp.float32), 'ln1_b': jnp.zeros((D,), jnp.float32),
        'ln2_g': jnp.ones((D,), jnp.float32), 'ln2_b': jnp.zeros((D,), jnp.float32),
        'ln3_g': jnp.ones((D,), jnp.float32), 'ln3_b': jnp.zeros((D,), jnp.float32),
        'sa_wqkv': wqkv,                      # packed Wq | Wk | Wv (bias-free)
        'sa_wo':   w(keys[1], D, D),
        'ca_wq':   wq_cross,
        'ca_wkv':  w(keys[3], D, 2 * D),      # packed Wk | Wv (bias-free)
        'ca_wo':   w(keys[4], D, D),
        'ffn_w1':  w(keys[5], D, 4 * D), 'ffn_b1': jnp.zeros((4 * D,), jnp.float32),
        'ffn_w2':  w(keys[6], 4 * D, D), 'ffn_b2': jnp.zeros((D,), jnp.float32),
    }
    return jax.tree_util.tree_map(lambda a: a.astype(dtype), p)


if __name__ == "__main__":
    # batch, tgt len, src len, d_model, heads (D = 128 keeps all blocks lane-aligned)
    B, T, S, D, H = 2, 8, 8, 128, 4

    key = jax.random.PRNGKey(0)
    k_in, k_enc, k_par = jax.random.split(key, 3)
    x = jax.random.normal(k_in, (B, T, D), jnp.float32).astype(jnp.bfloat16)
    enc = jax.random.normal(k_enc, (B, S, D), jnp.float32).astype(jnp.bfloat16)
    params = init_params(k_par, D, H)

    fwd = jax.jit(functools.partial(transformer_decoder_block, num_heads=H,
                                    causal_mask=True, is_first=False))
    out = fwd(params, x, enc)
    jax.block_until_ready(out)
    assert out.shape == (B, T, D)
    assert bool(jnp.isfinite(out.astype(jnp.float32)).all())
    print("KERNEL_OK")
</pallas_src>

<mosaic_0001>
module attributes {stable_mosaic.version = 11 : i64} {
  func.func @_mha_kernel(%arg0: i32, %arg1: i32, %arg2: memref<1x8x128xbf16, #tpu.memory_space<vmem>>, %arg3: memref<1x8x128xbf16, #tpu.memory_space<vmem>>, %arg4: memref<1x8x128xbf16, #tpu.memory_space<vmem>>, %arg5: memref<1x8x128xbf16, #tpu.memory_space<vmem>>) attributes {dimension_semantics = [#tpu.dimension_semantics<parallel>, #tpu.dimension_semantics<parallel>], iteration_bounds = array<i64: 2, 1>, scalar_prefetch = 0 : i64, scratch_operands = 0 : i64, tpu.core_type = #tpu.core_type<tc>, window_params = [{transform_indices = @transform_0, window_bounds = array<i64: 1, 8, 128>}, {transform_indices = @transform_1, window_bounds = array<i64: 1, 8, 128>}, {transform_indices = @transform_2, window_bounds = array<i64: 1, 8, 128>}, {transform_indices = @transform_3, window_bounds = array<i64: 1, 8, 128>}]} {
    %c0 = arith.constant 0 : index
    %c0_0 = arith.constant 0 : index
    %c0_1 = arith.constant 0 : index
    %0 = vector.load %arg2[%c0, %c0_0, %c0_1] : memref<1x8x128xbf16, #tpu.memory_space<vmem>>, vector<1x8x128xbf16>
    %1 = vector.shape_cast %0 : vector<1x8x128xbf16> to vector<8x128xbf16>
    %c0_2 = arith.constant 0 : index
    %c0_3 = arith.constant 0 : index
    %c0_4 = arith.constant 0 : index
    %2 = vector.load %arg3[%c0_2, %c0_3, %c0_4] : memref<1x8x128xbf16, #tpu.memory_space<vmem>>, vector<1x8x128xbf16>
    %3 = vector.shape_cast %2 : vector<1x8x128xbf16> to vector<8x128xbf16>
    %c0_5 = arith.constant 0 : index
    %c0_6 = arith.constant 0 : index
    %c0_7 = arith.constant 0 : index
    %4 = vector.load %arg4[%c0_5, %c0_6, %c0_7] : memref<1x8x128xbf16, #tpu.memory_space<vmem>>, vector<1x8x128xbf16>
    %5 = vector.shape_cast %4 : vector<1x8x128xbf16> to vector<8x128xbf16>
    %6 = tpu.iota {dimensions = array<i32: 0>} : vector<8x8xi32>
    %c8_i32 = arith.constant 8 : i32
    %7 = arith.muli %arg1, %c8_i32 : i32
    %8 = vector.broadcast %7 : i32 to vector<8x8xi32>
    %9 = arith.addi %6, %8 : vector<8x8xi32>
    %10 = tpu.iota {dimensions = array<i32: 1>} : vector<8x8xi32>
    %11 = arith.cmpi sgt, %10, %9 : vector<8x8xi32>
    %cst = arith.constant 0xFF800000 : f32
    %cst_8 = arith.constant 0.000000e+00 : f32
    %12 = vector.broadcast %cst : f32 to vector<8x8xf32>
    %13 = vector.broadcast %cst_8 : f32 to vector<8x8xf32>
    %14 = arith.select %11, %12, %13 : vector<8x8xi1>, vector<8x8xf32>
    %15 = vector.extract_strided_slice %1 {offsets = [0, 0], sizes = [8, 32], strides = [1, 1]} : vector<8x128xbf16> to vector<8x32xbf16>
    %16 = vector.extract_strided_slice %3 {offsets = [0, 0], sizes = [8, 32], strides = [1, 1]} : vector<8x128xbf16> to vector<8x32xbf16>
    %cst_9 = arith.constant dense<0.000000e+00> : vector<8x8xf32>
    %17 = tpu.matmul %15, %16, %cst_9 {dimension_numbers = #tpu.dot_dimension_numbers<[1], [1], [0], [0], [0, 0, 1, 0], [], []>} : vector<8x32xbf16>, vector<8x32xbf16>, vector<8x8xf32> -> vector<8x8xf32>
    %18 = arith.addf %17, %14 : vector<8x8xf32>
    %cst_10 = arith.constant dense<0xFF800000> : vector<8xf32>
    %19 = vector.multi_reduction <maximumf>, %18, %cst_10 [1] : vector<8x8xf32> to vector<8xf32>
    %20 = vector.shape_cast %19 : vector<8xf32> to vector<8x1xf32>
    %21 = vector.broadcast %20 : vector<8x1xf32> to vector<8x8xf32>
    %22 = arith.subf %18, %21 : vector<8x8xf32>
    %23 = math.exp %22 : vector<8x8xf32>
    %cst_11 = arith.constant dense<0.000000e+00> : vector<8xf32>
    %24 = vector.multi_reduction <add>, %23, %cst_11 [1] : vector<8x8xf32> to vector<8xf32>
    %25 = vector.shape_cast %24 : vector<8xf32> to vector<8x1xf32>
    %26 = arith.truncf %23 : vector<8x8xf32> to vector<8x8xbf16>
    %27 = vector.extract_strided_slice %5 {offsets = [0, 0], sizes = [8, 32], strides = [1, 1]} : vector<8x128xbf16> to vector<8x32xbf16>
    %cst_12 = arith.constant dense<0.000000e+00> : vector<8x32xf32>
    %28 = tpu.matmul %26, %27, %cst_12 {dimension_numbers = #tpu.dot_dimension_numbers<[1], [0], [0], [1], [0, 0, 1, 1], [], []>} : vector<8x8xbf16>, vector<8x32xbf16>, vector<8x32xf32> -> vector<8x32xf32>
    %29 = tpu.reciprocal %25 {approx = true} : vector<8x1xf32> -> vector<8x1xf32>
    %30 = vector.broadcast %29 : vector<8x1xf32> to vector<8x32xf32>
    %31 = arith.mulf %28, %30 : vector<8x32xf32>
    %32 = arith.truncf %31 : vector<8x32xf32> to vector<8x32xbf16>
    %c0_13 = arith.constant 0 : index
    %c0_14 = arith.constant 0 : index
    %c0_15 = arith.constant 0 : index
    %33 = vector.load %arg5[%c0_13, %c0_14, %c0_15] : memref<1x8x128xbf16, #tpu.memory_space<vmem>>, vector<1x8x32xbf16>
    %34 = vector.shape_cast %33 : vector<1x8x32xbf16> to vector<8x32xbf16>
    %35 = vector.shape_cast %32 : vector<8x32xbf16> to vector<1x8x32xbf16>
    tpu.vector_store %arg5[%c0_13, %c0_14, %c0_15], %35 {strides = array<i32>} : memref<1x8x128xbf16, #tpu.memory_space<vmem>>, vector<1x8x32xbf16>,
    %36 = vector.extract_strided_slice %1 {offsets = [0, 32], sizes = [8, 32], strides = [1, 1]} : vector<8x128xbf16> to vector<8x32xbf16>
    %37 = vector.extract_strided_slice %3 {offsets = [0, 32], sizes = [8, 32], strides = [1, 1]} : vector<8x128xbf16> to vector<8x32xbf16>
    %cst_16 = arith.constant dense<0.000000e+00> : vector<8x8xf32>
    %38 = tpu.matmul %36, %37, %cst_16 {dimension_numbers = #tpu.dot_dimension_numbers<[1], [1], [0], [0], [0, 0, 1, 0], [], []>} : vector<8x32xbf16>, vector<8x32xbf16>, vector<8x8xf32> -> vector<8x8xf32>
    %39 = arith.addf %38, %14 : vector<8x8xf32>
    %cst_17 = arith.constant dense<0xFF800000> : vector<8xf32>
    %40 = vector.multi_reduction <maximumf>, %39, %cst_17 [1] : vector<8x8xf32> to vector<8xf32>
    %41 = vector.shape_cast %40 : vector<8xf32> to vector<8x1xf32>
    %42 = vector.broadcast %41 : vector<8x1xf32> to vector<8x8xf32>
    %43 = arith.subf %39, %42 : vector<8x8xf32>
    %44 = math.exp %43 : vector<8x8xf32>
    %cst_18 = arith.constant dense<0.000000e+00> : vector<8xf32>
    %45 = vector.multi_reduction <add>, %44, %cst_18 [1] : vector<8x8xf32> to vector<8xf32>
    %46 = vector.shape_cast %45 : vector<8xf32> to vector<8x1xf32>
    %47 = arith.truncf %44 : vector<8x8xf32> to vector<8x8xbf16>
    %48 = vector.extract_strided_slice %5 {offsets = [0, 32], sizes = [8, 32], strides = [1, 1]} : vector<8x128xbf16> to vector<8x32xbf16>
    %cst_19 = arith.constant dense<0.000000e+00> : vector<8x32xf32>
    %49 = tpu.matmul %47, %48, %cst_19 {dimension_numbers = #tpu.dot_dimension_numbers<[1], [0], [0], [1], [0, 0, 1, 1], [], []>} : vector<8x8xbf16>, vector<8x32xbf16>, vector<8x32xf32> -> vector<8x32xf32>
    %50 = tpu.reciprocal %46 {approx = true} : vector<8x1xf32> -> vector<8x1xf32>
    %51 = vector.broadcast %50 : vector<8x1xf32> to vector<8x32xf32>
    %52 = arith.mulf %49, %51 : vector<8x32xf32>
    %53 = arith.truncf %52 : vector<8x32xf32> to vector<8x32xbf16>
    %c0_20 = arith.constant 0 : index
    %c0_21 = arith.constant 0 : index
    %c32 = arith.constant 32 : index
    %54 = vector.load %arg5[%c0_20, %c0_21, %c32] : memref<1x8x128xbf16, #tpu.memory_space<vmem>>, vector<1x8x32xbf16>
    %55 = vector.shape_cast %54 : vector<1x8x32xbf16> to vector<8x32xbf16>
    %56 = vector.shape_cast %53 : vector<8x32xbf16> to vector<1x8x32xbf16>
    tpu.vector_store %arg5[%c0_20, %c0_21, %c32], %56 {strides = array<i32>} : memref<1x8x128xbf16, #tpu.memory_space<vmem>>, vector<1x8x32xbf16>,
    %57 = vector.extract_strided_slice %1 {offsets = [0, 64], sizes = [8, 32], strides = [1, 1]} : vector<8x128xbf16> to vector<8x32xbf16>
    %58 = vector.extract_strided_slice %3 {offsets = [0, 64], sizes = [8, 32], strides = [1, 1]} : vector<8x128xbf16> to vector<8x32xbf16>
    %cst_22 = arith.constant dense<0.000000e+00> : vector<8x8xf32>
    %59 = tpu.matmul %57, %58, %cst_22 {dimension_numbers = #tpu.dot_dimension_numbers<[1], [1], [0], [0], [0, 0, 1, 0], [], []>} : vector<8x32xbf16>, vector<8x32xbf16>, vector<8x8xf32> -> vector<8x8xf32>
    %60 = arith.addf %59, %14 : vector<8x8xf32>
    %cst_23 = arith.constant dense<0xFF800000> : vector<8xf32>
    %61 = vector.multi_reduction <maximumf>, %60, %cst_23 [1] : vector<8x8xf32> to vector<8xf32>
    %62 = vector.shape_cast %61 : vector<8xf32> to vector<8x1xf32>
    %63 = vector.broadcast %62 : vector<8x1xf32> to vector<8x8xf32>
    %64 = arith.subf %60, %63 : vector<8x8xf32>
    %65 = math.exp %64 : vector<8x8xf32>
    %cst_24 = arith.constant dense<0.000000e+00> : vector<8xf32>
    %66 = vector.multi_reduction <add>, %65, %cst_24 [1] : vector<8x8xf32> to vector<8xf32>
    %67 = vector.shape_cast %66 : vector<8xf32> to vector<8x1xf32>
    %68 = arith.truncf %65 : vector<8x8xf32> to vector<8x8xbf16>
    %69 = vector.extract_strided_slice %5 {offsets = [0, 64], sizes = [8, 32], strides = [1, 1]} : vector<8x128xbf16> to vector<8x32xbf16>
    %cst_25 = arith.constant dense<0.000000e+00> : vector<8x32xf32>
    %70 = tpu.matmul %68, %69, %cst_25 {dimension_numbers = #tpu.dot_dimension_numbers<[1], [0], [0], [1], [0, 0, 1, 1], [], []>} : vector<8x8xbf16>, vector<8x32xbf16>, vector<8x32xf32> -> vector<8x32xf32>
    %71 = tpu.reciprocal %67 {approx = true} : vector<8x1xf32> -> vector<8x1xf32>
    %72 = vector.broadcast %71 : vector<8x1xf32> to vector<8x32xf32>
    %73 = arith.mulf %70, %72 : vector<8x32xf32>
    %74 = arith.truncf %73 : vector<8x32xf32> to vector<8x32xbf16>
    %c0_26 = arith.constant 0 : index
    %c0_27 = arith.constant 0 : index
    %c64 = arith.constant 64 : index
    %75 = vector.load %arg5[%c0_26, %c0_27, %c64] : memref<1x8x128xbf16, #tpu.memory_space<vmem>>, vector<1x8x32xbf16>
    %76 = vector.shape_cast %75 : vector<1x8x32xbf16> to vector<8x32xbf16>
    %77 = vector.shape_cast %74 : vector<8x32xbf16> to vector<1x8x32xbf16>
    tpu.vector_store %arg5[%c0_26, %c0_27, %c64], %77 {strides = array<i32>} : memref<1x8x128xbf16, #tpu.memory_space<vmem>>, vector<1x8x32xbf16>,
    %78 = vector.extract_strided_slice %1 {offsets = [0, 96], sizes = [8, 32], strides = [1, 1]} : vector<8x128xbf16> to vector<8x32xbf16>
    %79 = vector.extract_strided_slice %3 {offsets = [0, 96], sizes = [8, 32], strides = [1, 1]} : vector<8x128xbf16> to vector<8x32xbf16>
    %cst_28 = arith.constant dense<0.000000e+00> : vector<8x8xf32>
    %80 = tpu.matmul %78, %79, %cst_28 {dimension_numbers = #tpu.dot_dimension_numbers<[1], [1], [0], [0], [0, 0, 1, 0], [], []>} : vector<8x32xbf16>, vector<8x32xbf16>, vector<8x8xf32> -> vector<8x8xf32>
    %81 = arith.addf %80, %14 : vector<8x8xf32>
    %cst_29 = arith.constant dense<0xFF800000> : vector<8xf32>
    %82 = vector.multi_reduction <maximumf>, %81, %cst_29 [1] : vector<8x8xf32> to vector<8xf32>
    %83 = vector.shape_cast %82 : vector<8xf32> to vector<8x1xf32>
    %84 = vector.broadcast %83 : vector<8x1xf32> to vector<8x8xf32>
    %85 = arith.subf %81, %84 : vector<8x8xf32>
    %86 = math.exp %85 : vector<8x8xf32>
    %cst_30 = arith.constant dense<0.000000e+00> : vector<8xf32>
    %87 = vector.multi_reduction <add>, %86, %cst_30 [1] : vector<8x8xf32> to vector<8xf32>
    %88 = vector.shape_cast %87 : vector<8xf32> to vector<8x1xf32>
    %89 = arith.truncf %86 : vector<8x8xf32> to vector<8x8xbf16>
    %90 = vector.extract_strided_slice %5 {offsets = [0, 96], sizes = [8, 32], strides = [1, 1]} : vector<8x128xbf16> to vector<8x32xbf16>
    %cst_31 = arith.constant dense<0.000000e+00> : vector<8x32xf32>
    %91 = tpu.matmul %89, %90, %cst_31 {dimension_numbers = #tpu.dot_dimension_numbers<[1], [0], [0], [1], [0, 0, 1, 1], [], []>} : vector<8x8xbf16>, vector<8x32xbf16>, vector<8x32xf32> -> vector<8x32xf32>
    %92 = tpu.reciprocal %88 {approx = true} : vector<8x1xf32> -> vector<8x1xf32>
    %93 = vector.broadcast %92 : vector<8x1xf32> to vector<8x32xf32>
    %94 = arith.mulf %91, %93 : vector<8x32xf32>
    %95 = arith.truncf %94 : vector<8x32xf32> to vector<8x32xbf16>
    %c0_32 = arith.constant 0 : index
    %c0_33 = arith.constant 0 : index
    %c96 = arith.constant 96 : index
    %96 = vector.load %arg5[%c0_32, %c0_33, %c96] : memref<1x8x128xbf16, #tpu.memory_space<vmem>>, vector<1x8x32xbf16>
    %97 = vector.shape_cast %96 : vector<1x8x32xbf16> to vector<8x32xbf16>
    %98 = vector.shape_cast %95 : vector<8x32xbf16> to vector<1x8x32xbf16>
    tpu.vector_store %arg5[%c0_32, %c0_33, %c96], %98 {strides = array<i32>} : memref<1x8x128xbf16, #tpu.memory_space<vmem>>, vector<1x8x32xbf16>,
    return
  }
  func.func @transform_0(%arg0: i32, %arg1: i32) -> (i32, i32, i32) {
    %c0_i32 = arith.constant 0 : i32
    %c0_i32_0 = arith.constant 0 : i32
    return %arg0, %arg1, %c0_i32 : i32, i32, i32
  }
  func.func @transform_1(%arg0: i32, %arg1: i32) -> (i32, i32, i32) {
    %c0_i32 = arith.constant 0 : i32
    %c1_i32 = arith.constant 1 : i32
    %c0_i32_0 = arith.constant 0 : i32
    return %arg0, %c0_i32, %c1_i32 : i32, i32, i32
  }
  func.func @transform_2(%arg0: i32, %arg1: i32) -> (i32, i32, i32) {
    %c0_i32 = arith.constant 0 : i32
    %c2_i32 = arith.constant 2 : i32
    %c0_i32_0 = arith.constant 0 : i32
    return %arg0, %c0_i32, %c2_i32 : i32, i32, i32
  }
  func.func @transform_3(%arg0: i32, %arg1: i32) -> (i32, i32, i32) {
    %c0_i32 = arith.constant 0 : i32
    %c0_i32_0 = arith.constant 0 : i32
    return %arg0, %arg1, %c0_i32 : i32, i32, i32
  }
}

module attributes {stable_mosaic.version = 11 : i64} {
  func.func @_matmul_kernel(%arg0: i32, %arg1: i32, %arg2: i32, %arg3: memref<16x128xbf16, #tpu.memory_space<vmem>>, %arg4: memref<128x128xbf16, #tpu.memory_space<vmem>>, %arg5: memref<16x128xbf16, #tpu.memory_space<vmem>>, %arg6: memref<16x128xbf16, #tpu.memory_space<vmem>>, %arg7: memref<16x128xf32, #tpu.memory_space<vmem>>) attributes {dimension_semantics = [#tpu.dimension_semantics<parallel>, #tpu.dimension_semantics<parallel>, #tpu.dimension_semantics<arbitrary>], iteration_bounds = array<i64: 1, 1, 1>, scalar_prefetch = 0 : i64, scratch_operands = 1 : i64, tpu.core_type = #tpu.core_type<tc>, window_params = [{transform_indices = @transform_0, window_bounds = array<i64: 16, 128>}, {transform_indices = @transform_1, window_bounds = array<i64: 128, 128>}, {pipeline_mode = #tpu.pipeline_mode<synchronous>, transform_indices = @transform_2, window_bounds = array<i64: 16, 128>}, {transform_indices = @transform_3, window_bounds = array<i64: 16, 128>}]} {
    %c0_i32 = arith.constant 0 : i32
    %0 = arith.cmpi eq, %arg2, %c0_i32 : i32
    %1 = arith.extui %0 : i1 to i32
    %c0_i32_0 = arith.constant 0 : i32
    %2 = arith.cmpi ne, %1, %c0_i32_0 : i32
    scf.if %2 {
      %cst_10 = arith.constant 0.000000e+00 : f32
      %12 = vector.broadcast %cst_10 : f32 to vector<16x128xf32>
      %c0_11 = arith.constant 0 : index
      %c0_12 = arith.constant 0 : index
      %13 = vector.load %arg7[%c0_11, %c0_12] : memref<16x128xf32, #tpu.memory_space<vmem>>, vector<16x128xf32>
      tpu.vector_store %arg7[%c0_11, %c0_12], %12 {strides = array<i32>} : memref<16x128xf32, #tpu.memory_space<vmem>>, vector<16x128xf32>,
    } else {
    }
    %c0 = arith.constant 0 : index
    %c0_1 = arith.constant 0 : index
    %3 = vector.load %arg7[%c0, %c0_1] : memref<16x128xf32, #tpu.memory_space<vmem>>, vector<16x128xf32>
    %c0_2 = arith.constant 0 : index
    %c0_3 = arith.constant 0 : index
    %4 = vector.load %arg3[%c0_2, %c0_3] : memref<16x128xbf16, #tpu.memory_space<vmem>>, vector<16x128xbf16>
    %c0_4 = arith.constant 0 : index
    %c0_5 = arith.constant 0 : index
    %5 = vector.load %arg4[%c0_4, %c0_5] : memref<128x128xbf16, #tpu.memory_space<vmem>>, vector<128x128xbf16>
    %cst = arith.constant dense<0.000000e+00> : vector<16x128xf32>
    %6 = tpu.matmul %4, %5, %cst {dimension_numbers = #tpu.dot_dimension_numbers<[1], [0], [0], [1], [0, 0, 1, 1], [], []>} : vector<16x128xbf16>, vector<128x128xbf16>, vector<16x128xf32> -> vector<16x128xf32>
    %7 = arith.addf %3, %6 : vector<16x128xf32>
    %c0_6 = arith.constant 0 : index
    %c0_7 = arith.constant 0 : index
    %8 = vector.load %arg7[%c0_6, %c0_7] : memref<16x128xf32, #tpu.memory_space<vmem>>, vector<16x128xf32>
    tpu.vector_store %arg7[%c0_6, %c0_7], %7 {strides = array<i32>} : memref<16x128xf32, #tpu.memory_space<vmem>>, vector<16x128xf32>,
    %c0_i32_8 = arith.constant 0 : i32
    %9 = arith.cmpi eq, %arg2, %c0_i32_8 : i32
    %10 = arith.extui %9 : i1 to i32
    %c0_i32_9 = arith.constant 0 : i32
    %11 = arith.cmpi ne, %10, %c0_i32_9 : i32
    scf.if %11 {
      %c0_10 = arith.constant 0 : index
      %c0_11 = arith.constant 0 : index
      %12 = vector.load %arg7[%c0_10, %c0_11] : memref<16x128xf32, #tpu.memory_space<vmem>>, vector<16x128xf32>
      %c0_12 = arith.constant 0 : index
      %c0_13 = arith.constant 0 : index
      %13 = vector.load %arg5[%c0_12, %c0_13] : memref<16x128xbf16, #tpu.memory_space<vmem>>, vector<16x128xbf16>
      %14 = arith.extf %13 : vector<16x128xbf16> to vector<16x128xf32>
      %15 = arith.addf %12, %14 : vector<16x128xf32>
      %16 = arith.truncf %15 : vector<16x128xf32> to vector<16x128xbf16>
      %c0_14 = arith.constant 0 : index
      %c0_15 = arith.constant 0 : index
      %17 = vector.load %arg6[%c0_14, %c0_15] : memref<16x128xbf16, #tpu.memory_space<vmem>>, vector<16x128xbf16>
      tpu.vector_store %arg6[%c0_14, %c0_15], %16 {strides = array<i32>} : memref<16x128xbf16, #tpu.memory_space<vmem>>, vector<16x128xbf16>,
    } else {
    }
    return
  }
  func.func @transform_0(%arg0: i32, %arg1: i32, %arg2: i32) -> (i32, i32) {
    %c0_i32 = arith.constant 0 : i32
    return %arg0, %arg2 : i32, i32
  }
  func.func @transform_1(%arg0: i32, %arg1: i32, %arg2: i32) -> (i32, i32) {
    %c0_i32 = arith.constant 0 : i32
    return %arg2, %arg1 : i32, i32
  }
  func.func @transform_2(%arg0: i32, %arg1: i32, %arg2: i32) -> (i32, i32) {
    %c0_i32 = arith.constant 0 : i32
    return %arg0, %arg1 : i32, i32
  }
  func.func @transform_3(%arg0: i32, %arg1: i32, %arg2: i32) -> (i32, i32) {
    %c0_i32 = arith.constant 0 : i32
    return %arg0, %arg1 : i32, i32
  }
}

module attributes {stable_mosaic.version = 11 : i64} {
  func.func @_ln_linear_kernel(%arg0: i32, %arg1: i32, %arg2: memref<16x128xbf16, #tpu.memory_space<vmem>>, %arg3: memref<1x128xbf16, #tpu.memory_space<vmem>>, %arg4: memref<1x128xbf16, #tpu.memory_space<vmem>>, %arg5: memref<128x128xbf16, #tpu.memory_space<vmem>>, %arg6: memref<16x128xbf16, #tpu.memory_space<vmem>>, %arg7: memref<16x128xbf16, #tpu.memory_space<vmem>>) attributes {dimension_semantics = [#tpu.dimension_semantics<parallel>, #tpu.dimension_semantics<arbitrary>], iteration_bounds = array<i64: 1, 1>, scalar_prefetch = 0 : i64, scratch_operands = 1 : i64, tpu.core_type = #tpu.core_type<tc>, window_params = [{transform_indices = @transform_0, window_bounds = array<i64: 16, 128>}, {pipeline_mode = #tpu.pipeline_mode<synchronous>, transform_indices = @transform_1, window_bounds = array<i64: 1, 128>}, {pipeline_mode = #tpu.pipeline_mode<synchronous>, transform_indices = @transform_2, window_bounds = array<i64: 1, 128>}, {transform_indices = @transform_3, window_bounds = array<i64: 128, 128>}, {transform_indices = @transform_4, window_bounds = array<i64: 16, 128>}]} {
    %c0_i32 = arith.constant 0 : i32
    %0 = arith.cmpi eq, %arg1, %c0_i32 : i32
    %1 = arith.extui %0 : i1 to i32
    %c0_i32_0 = arith.constant 0 : i32
    %2 = arith.cmpi ne, %1, %c0_i32_0 : i32
    scf.if %2 {
      %c0_6 = arith.constant 0 : index
      %c0_7 = arith.constant 0 : index
      %8 = vector.load %arg2[%c0_6, %c0_7] : memref<16x128xbf16, #tpu.memory_space<vmem>>, vector<16x128xbf16>
      %9 = arith.extf %8 : vector<16x128xbf16> to vector<16x128xf32>
      %cst_8 = arith.constant dense<0.000000e+00> : vector<16xf32>
      %10 = vector.multi_reduction <add>, %9, %cst_8 [1] : vector<16x128xf32> to vector<16xf32>
      %11 = vector.shape_cast %10 : vector<16xf32> to vector<16x1xf32>
      %cst_9 = arith.constant 1.280000e+02 : f32
      %12 = vector.broadcast %cst_9 : f32 to vector<16x1xf32>
      %13 = arith.divf %11, %12 : vector<16x1xf32>
      %14 = vector.broadcast %13 : vector<16x1xf32> to vector<16x128xf32>
      %15 = arith.subf %9, %14 : vector<16x128xf32>
      %16 = arith.mulf %15, %15 : vector<16x128xf32>
      %cst_10 = arith.constant dense<0.000000e+00> : vector<16xf32>
      %17 = vector.multi_reduction <add>, %16, %cst_10 [1] : vector<16x128xf32> to vector<16xf32>
      %18 = vector.shape_cast %17 : vector<16xf32> to vector<16x1xf32>
      %cst_11 = arith.constant 1.280000e+02 : f32
      %19 = vector.broadcast %cst_11 : f32 to vector<16x1xf32>
      %20 = arith.divf %18, %19 : vector<16x1xf32>
      %21 = vector.broadcast %13 : vector<16x1xf32> to vector<16x128xf32>
      %22 = arith.subf %9, %21 : vector<16x128xf32>
      %cst_12 = arith.constant 9.99999974E-6 : f32
      %23 = vector.broadcast %cst_12 : f32 to vector<16x1xf32>
      %24 = arith.addf %20, %23 : vector<16x1xf32>
      %25 = math.rsqrt %24 : vector<16x1xf32>
      %26 = vector.broadcast %25 : vector<16x1xf32> to vector<16x128xf32>
      %27 = arith.mulf %22, %26 : vector<16x128xf32>
      %c0_13 = arith.constant 0 : index
      %c0_14 = arith.constant 0 : index
      %28 = vector.load %arg3[%c0_13, %c0_14] : memref<1x128xbf16, #tpu.memory_space<vmem>>, vector<1x128xbf16>
      %29 = arith.extf %28 : vector<1x128xbf16> to vector<1x128xf32>
      %30 = vector.broadcast %29 : vector<1x128xf32> to vector<16x128xf32>
      %31 = arith.mulf %27, %30 : vector<16x128xf32>
      %c0_15 = arith.constant 0 : index
      %c0_16 = arith.constant 0 : index
      %32 = vector.load %arg4[%c0_15, %c0_16] : memref<1x128xbf16, #tpu.memory_space<vmem>>, vector<1x128xbf16>
      %33 = arith.extf %32 : vector<1x128xbf16> to vector<1x128xf32>
      %34 = vector.broadcast %33 : vector<1x128xf32> to vector<16x128xf32>
      %35 = arith.addf %31, %34 : vector<16x128xf32>
      %36 = arith.truncf %35 : vector<16x128xf32> to vector<16x128xbf16>
      %c0_17 = arith.constant 0 : index
      %c0_18 = arith.constant 0 : index
      %37 = vector.load %arg7[%c0_17, %c0_18] : memref<16x128xbf16, #tpu.memory_space<vmem>>, vector<16x128xbf16>
      tpu.vector_store %arg7[%c0_17, %c0_18], %36 {strides = array<i32>} : memref<16x128xbf16, #tpu.memory_space<vmem>>, vector<16x128xbf16>,
    } else {
    }
    %c0 = arith.constant 0 : index
    %c0_1 = arith.constant 0 : index
    %3 = vector.load %arg7[%c0, %c0_1] : memref<16x128xbf16, #tpu.memory_space<vmem>>, vector<16x128xbf16>
    %c0_2 = arith.constant 0 : index
    %c0_3 = arith.constant 0 : index
    %4 = vector.load %arg5[%c0_2, %c0_3] : memref<128x128xbf16, #tpu.memory_space<vmem>>, vector<128x128xbf16>
    %cst = arith.constant dense<0.000000e+00> : vector<16x128xf32>
    %5 = tpu.matmul %3, %4, %cst {dimension_numbers = #tpu.dot_dimension_numbers<[1], [0], [0], [1], [0, 0, 1, 1], [], []>} : vector<16x128xbf16>, vector<128x128xbf16>, vector<16x128xf32> -> vector<16x128xf32>
    %6 = arith.truncf %5 : vector<16x128xf32> to vector<16x128xbf16>
    %c0_4 = arith.constant 0 : index
    %c0_5 = arith.constant 0 : index
    %7 = vector.load %arg6[%c0_4, %c0_5] : memref<16x128xbf16, #tpu.memory_space<vmem>>, vector<16x128xbf16>
    tpu.vector_store %arg6[%c0_4, %c0_5], %6 {strides = array<i32>} : memref<16x128xbf16, #tpu.memory_space<vmem>>, vector<16x128xbf16>,
    return
  }
  func.func @transform_0(%arg0: i32, %arg1: i32) -> (i32, i32) {
    %c0_i32 = arith.constant 0 : i32
    %c0_i32_0 = arith.constant 0 : i32
    return %arg0, %c0_i32 : i32, i32
  }
  func.func @transform_1(%arg0: i32, %arg1: i32) -> (i32, i32) {
    %c0_i32 = arith.constant 0 : i32
    %c0_i32_0 = arith.constant 0 : i32
    %c0_i32_1 = arith.constant 0 : i32
    return %c0_i32, %c0_i32_0 : i32, i32
  }
  func.func @transform_2(%arg0: i32, %arg1: i32) -> (i32, i32) {
    %c0_i32 = arith.constant 0 : i32
    %c0_i32_0 = arith.constant 0 : i32
    %c0_i32_1 = arith.constant 0 : i32
    return %c0_i32, %c0_i32_0 : i32, i32
  }
  func.func @transform_3(%arg0: i32, %arg1: i32) -> (i32, i32) {
    %c0_i32 = arith.constant 0 : i32
    %c0_i32_0 = arith.constant 0 : i32
    return %c0_i32, %arg1 : i32, i32
  }
  func.func @transform_4(%arg0: i32, %arg1: i32) -> (i32, i32) {
    %c0_i32 = arith.constant 0 : i32
    return %arg0, %arg1 : i32, i32
  }
}

module attributes {stable_mosaic.version = 11 : i64} {
  func.func @_ln_linear_kernel(%arg0: i32, %arg1: i32, %arg2: memref<16x128xbf16, #tpu.memory_space<vmem>>, %arg3: memref<1x128xbf16, #tpu.memory_space<vmem>>, %arg4: memref<1x128xbf16, #tpu.memory_space<vmem>>, %arg5: memref<128x384xbf16, #tpu.memory_space<vmem>>, %arg6: memref<16x384xbf16, #tpu.memory_space<vmem>>, %arg7: memref<16x128xbf16, #tpu.memory_space<vmem>>) attributes {dimension_semantics = [#tpu.dimension_semantics<parallel>, #tpu.dimension_semantics<arbitrary>], iteration_bounds = array<i64: 1, 1>, scalar_prefetch = 0 : i64, scratch_operands = 1 : i64, tpu.core_type = #tpu.core_type<tc>, window_params = [{transform_indices = @transform_0, window_bounds = array<i64: 16, 128>}, {pipeline_mode = #tpu.pipeline_mode<synchronous>, transform_indices = @transform_1, window_bounds = array<i64: 1, 128>}, {pipeline_mode = #tpu.pipeline_mode<synchronous>, transform_indices = @transform_2, window_bounds = array<i64: 1, 128>}, {transform_indices = @transform_3, window_bounds = array<i64: 128, 384>}, {transform_indices = @transform_4, window_bounds = array<i64: 16, 384>}]} {
    %c0_i32 = arith.constant 0 : i32
    %0 = arith.cmpi eq, %arg1, %c0_i32 : i32
    %1 = arith.extui %0 : i1 to i32
    %c0_i32_0 = arith.constant 0 : i32
    %2 = arith.cmpi ne, %1, %c0_i32_0 : i32
    scf.if %2 {
      %c0_6 = arith.constant 0 : index
      %c0_7 = arith.constant 0 : index
      %8 = vector.load %arg2[%c0_6, %c0_7] : memref<16x128xbf16, #tpu.memory_space<vmem>>, vector<16x128xbf16>
      %9 = arith.extf %8 : vector<16x128xbf16> to vector<16x128xf32>
      %cst_8 = arith.constant dense<0.000000e+00> : vector<16xf32>
      %10 = vector.multi_reduction <add>, %9, %cst_8 [1] : vector<16x128xf32> to vector<16xf32>
      %11 = vector.shape_cast %10 : vector<16xf32> to vector<16x1xf32>
      %cst_9 = arith.constant 1.280000e+02 : f32
      %12 = vector.broadcast %cst_9 : f32 to vector<16x1xf32>
      %13 = arith.divf %11, %12 : vector<16x1xf32>
      %14 = vector.broadcast %13 : vector<16x1xf32> to vector<16x128xf32>
      %15 = arith.subf %9, %14 : vector<16x128xf32>
      %16 = arith.mulf %15, %15 : vector<16x128xf32>
      %cst_10 = arith.constant dense<0.000000e+00> : vector<16xf32>
      %17 = vector.multi_reduction <add>, %16, %cst_10 [1] : vector<16x128xf32> to vector<16xf32>
      %18 = vector.shape_cast %17 : vector<16xf32> to vector<16x1xf32>
      %cst_11 = arith.constant 1.280000e+02 : f32
      %19 = vector.broadcast %cst_11 : f32 to vector<16x1xf32>
      %20 = arith.divf %18, %19 : vector<16x1xf32>
      %21 = vector.broadcast %13 : vector<16x1xf32> to vector<16x128xf32>
      %22 = arith.subf %9, %21 : vector<16x128xf32>
      %cst_12 = arith.constant 9.99999974E-6 : f32
      %23 = vector.broadcast %cst_12 : f32 to vector<16x1xf32>
      %24 = arith.addf %20, %23 : vector<16x1xf32>
      %25 = math.rsqrt %24 : vector<16x1xf32>
      %26 = vector.broadcast %25 : vector<16x1xf32> to vector<16x128xf32>
      %27 = arith.mulf %22, %26 : vector<16x128xf32>
      %c0_13 = arith.constant 0 : index
      %c0_14 = arith.constant 0 : index
      %28 = vector.load %arg3[%c0_13, %c0_14] : memref<1x128xbf16, #tpu.memory_space<vmem>>, vector<1x128xbf16>
      %29 = arith.extf %28 : vector<1x128xbf16> to vector<1x128xf32>
      %30 = vector.broadcast %29 : vector<1x128xf32> to vector<16x128xf32>
      %31 = arith.mulf %27, %30 : vector<16x128xf32>
      %c0_15 = arith.constant 0 : index
      %c0_16 = arith.constant 0 : index
      %32 = vector.load %arg4[%c0_15, %c0_16] : memref<1x128xbf16, #tpu.memory_space<vmem>>, vector<1x128xbf16>
      %33 = arith.extf %32 : vector<1x128xbf16> to vector<1x128xf32>
      %34 = vector.broadcast %33 : vector<1x128xf32> to vector<16x128xf32>
      %35 = arith.addf %31, %34 : vector<16x128xf32>
      %36 = arith.truncf %35 : vector<16x128xf32> to vector<16x128xbf16>
      %c0_17 = arith.constant 0 : index
      %c0_18 = arith.constant 0 : index
      %37 = vector.load %arg7[%c0_17, %c0_18] : memref<16x128xbf16, #tpu.memory_space<vmem>>, vector<16x128xbf16>
      tpu.vector_store %arg7[%c0_17, %c0_18], %36 {strides = array<i32>} : memref<16x128xbf16, #tpu.memory_space<vmem>>, vector<16x128xbf16>,
    } else {
    }
    %c0 = arith.constant 0 : index
    %c0_1 = arith.constant 0 : index
    %3 = vector.load %arg7[%c0, %c0_1] : memref<16x128xbf16, #tpu.memory_space<vmem>>, vector<16x128xbf16>
    %c0_2 = arith.constant 0 : index
    %c0_3 = arith.constant 0 : index
    %4 = vector.load %arg5[%c0_2, %c0_3] : memref<128x384xbf16, #tpu.memory_space<vmem>>, vector<128x384xbf16>
    %cst = arith.constant dense<0.000000e+00> : vector<16x384xf32>
    %5 = tpu.matmul %3, %4, %cst {dimension_numbers = #tpu.dot_dimension_numbers<[1], [0], [0], [1], [0, 0, 1, 1], [], []>} : vector<16x128xbf16>, vector<128x384xbf16>, vector<16x384xf32> -> vector<16x384xf32>
    %6 = arith.truncf %5 : vector<16x384xf32> to vector<16x384xbf16>
    %c0_4 = arith.constant 0 : index
    %c0_5 = arith.constant 0 : index
    %7 = vector.load %arg6[%c0_4, %c0_5] : memref<16x384xbf16, #tpu.memory_space<vmem>>, vector<16x384xbf16>
    tpu.vector_store %arg6[%c0_4, %c0_5], %6 {strides = array<i32>} : memref<16x384xbf16, #tpu.memory_space<vmem>>, vector<16x384xbf16>,
    return
  }
  func.func @transform_0(%arg0: i32, %arg1: i32) -> (i32, i32) {
    %c0_i32 = arith.constant 0 : i32
    %c0_i32_0 = arith.constant 0 : i32
    return %arg0, %c0_i32 : i32, i32
  }
  func.func @transform_1(%arg0: i32, %arg1: i32) -> (i32, i32) {
    %c0_i32 = arith.constant 0 : i32
    %c0_i32_0 = arith.constant 0 : i32
    %c0_i32_1 = arith.constant 0 : i32
    return %c0_i32, %c0_i32_0 : i32, i32
  }
  func.func @transform_2(%arg0: i32, %arg1: i32) -> (i32, i32) {
    %c0_i32 = arith.constant 0 : i32
    %c0_i32_0 = arith.constant 0 : i32
    %c0_i32_1 = arith.constant 0 : i32
    return %c0_i32, %c0_i32_0 : i32, i32
  }
  func.func @transform_3(%arg0: i32, %arg1: i32) -> (i32, i32) {
    %c0_i32 = arith.constant 0 : i32
    %c0_i32_0 = arith.constant 0 : i32
    return %c0_i32, %arg1 : i32, i32
  }
  func.func @transform_4(%arg0: i32, %arg1: i32) -> (i32, i32) {
    %c0_i32 = arith.constant 0 : i32
    return %arg0, %arg1 : i32, i32
  }
}

module attributes {stable_mosaic.version = 11 : i64} {
  func.func @_matmul_kernel(%arg0: i32, %arg1: i32, %arg2: i32, %arg3: memref<16x128xbf16, #tpu.memory_space<vmem>>, %arg4: memref<128x256xbf16, #tpu.memory_space<vmem>>, %arg5: memref<16x256xbf16, #tpu.memory_space<vmem>>, %arg6: memref<16x256xf32, #tpu.memory_space<vmem>>) attributes {dimension_semantics = [#tpu.dimension_semantics<parallel>, #tpu.dimension_semantics<parallel>, #tpu.dimension_semantics<arbitrary>], iteration_bounds = array<i64: 1, 1, 1>, scalar_prefetch = 0 : i64, scratch_operands = 1 : i64, tpu.core_type = #tpu.core_type<tc>, window_params = [{transform_indices = @transform_0, window_bounds = array<i64: 16, 128>}, {transform_indices = @transform_1, window_bounds = array<i64: 128, 256>}, {transform_indices = @transform_2, window_bounds = array<i64: 16, 256>}]} {
    %c0_i32 = arith.constant 0 : i32
    %0 = arith.cmpi eq, %arg2, %c0_i32 : i32
    %1 = arith.extui %0 : i1 to i32
    %c0_i32_0 = arith.constant 0 : i32
    %2 = arith.cmpi ne, %1, %c0_i32_0 : i32
    scf.if %2 {
      %cst_10 = arith.constant 0.000000e+00 : f32
      %12 = vector.broadcast %cst_10 : f32 to vector<16x256xf32>
      %c0_11 = arith.constant 0 : index
      %c0_12 = arith.constant 0 : index
      %13 = vector.load %arg6[%c0_11, %c0_12] : memref<16x256xf32, #tpu.memory_space<vmem>>, vector<16x256xf32>
      tpu.vector_store %arg6[%c0_11, %c0_12], %12 {strides = array<i32>} : memref<16x256xf32, #tpu.memory_space<vmem>>, vector<16x256xf32>,
    } else {
    }
    %c0 = arith.constant 0 : index
    %c0_1 = arith.constant 0 : index
    %3 = vector.load %arg6[%c0, %c0_1] : memref<16x256xf32, #tpu.memory_space<vmem>>, vector<16x256xf32>
    %c0_2 = arith.constant 0 : index
    %c0_3 = arith.constant 0 : index
    %4 = vector.load %arg3[%c0_2, %c0_3] : memref<16x128xbf16, #tpu.memory_space<vmem>>, vector<16x128xbf16>
    %c0_4 = arith.constant 0 : index
    %c0_5 = arith.constant 0 : index
    %5 = vector.load %arg4[%c0_4, %c0_5] : memref<128x256xbf16, #tpu.memory_space<vmem>>, vector<128x256xbf16>
    %cst = arith.constant dense<0.000000e+00> : vector<16x256xf32>
    %6 = tpu.matmul %4, %5, %cst {dimension_numbers = #tpu.dot_dimension_numbers<[1], [0], [0], [1], [0, 0, 1, 1], [], []>} : vector<16x128xbf16>, vector<128x256xbf16>, vector<16x256xf32> -> vector<16x256xf32>
    %7 = arith.addf %3, %6 : vector<16x256xf32>
    %c0_6 = arith.constant 0 : index
    %c0_7 = arith.constant 0 : index
    %8 = vector.load %arg6[%c0_6, %c0_7] : memref<16x256xf32, #tpu.memory_space<vmem>>, vector<16x256xf32>
    tpu.vector_store %arg6[%c0_6, %c0_7], %7 {strides = array<i32>} : memref<16x256xf32, #tpu.memory_space<vmem>>, vector<16x256xf32>,
    %c0_i32_8 = arith.constant 0 : i32
    %9 = arith.cmpi eq, %arg2, %c0_i32_8 : i32
    %10 = arith.extui %9 : i1 to i32
    %c0_i32_9 = arith.constant 0 : i32
    %11 = arith.cmpi ne, %10, %c0_i32_9 : i32
    scf.if %11 {
      %c0_10 = arith.constant 0 : index
      %c0_11 = arith.constant 0 : index
      %12 = vector.load %arg6[%c0_10, %c0_11] : memref<16x256xf32, #tpu.memory_space<vmem>>, vector<16x256xf32>
      %13 = arith.truncf %12 : vector<16x256xf32> to vector<16x256xbf16>
      %c0_12 = arith.constant 0 : index
      %c0_13 = arith.constant 0 : index
      %14 = vector.load %arg5[%c0_12, %c0_13] : memref<16x256xbf16, #tpu.memory_space<vmem>>, vector<16x256xbf16>
      tpu.vector_store %arg5[%c0_12, %c0_13], %13 {strides = array<i32>} : memref<16x256xbf16, #tpu.memory_space<vmem>>, vector<16x256xbf16>,
    } else {
    }
    return
  }
  func.func @transform_0(%arg0: i32, %arg1: i32, %arg2: i32) -> (i32, i32) {
    %c0_i32 = arith.constant 0 : i32
    return %arg0, %arg2 : i32, i32
  }
  func.func @transform_1(%arg0: i32, %arg1: i32, %arg2: i32) -> (i32, i32) {
    %c0_i32 = arith.constant 0 : i32
    return %arg2, %arg1 : i32, i32
  }
  func.func @transform_2(%arg0: i32, %arg1: i32, %arg2: i32) -> (i32, i32) {
    %c0_i32 = arith.constant 0 : i32
    return %arg0, %arg1 : i32, i32
  }
}

module attributes {stable_mosaic.version = 11 : i64} {
  func.func @_mha_kernel(%arg0: i32, %arg1: i32, %arg2: memref<1x8x128xbf16, #tpu.memory_space<vmem>>, %arg3: memref<1x8x128xbf16, #tpu.memory_space<vmem>>, %arg4: memref<1x8x128xbf16, #tpu.memory_space<vmem>>, %arg5: memref<1x8x128xbf16, #tpu.memory_space<vmem>>) attributes {dimension_semantics = [#tpu.dimension_semantics<parallel>, #tpu.dimension_semantics<parallel>], iteration_bounds = array<i64: 2, 1>, scalar_prefetch = 0 : i64, scratch_operands = 0 : i64, tpu.core_type = #tpu.core_type<tc>, window_params = [{transform_indices = @transform_0, window_bounds = array<i64: 1, 8, 128>}, {transform_indices = @transform_1, window_bounds = array<i64: 1, 8, 128>}, {transform_indices = @transform_2, window_bounds = array<i64: 1, 8, 128>}, {transform_indices = @transform_3, window_bounds = array<i64: 1, 8, 128>}]} {
    %c0 = arith.constant 0 : index
    %c0_0 = arith.constant 0 : index
    %c0_1 = arith.constant 0 : index
    %0 = vector.load %arg2[%c0, %c0_0, %c0_1] : memref<1x8x128xbf16, #tpu.memory_space<vmem>>, vector<1x8x128xbf16>
    %1 = vector.shape_cast %0 : vector<1x8x128xbf16> to vector<8x128xbf16>
    %c0_2 = arith.constant 0 : index
    %c0_3 = arith.constant 0 : index
    %c0_4 = arith.constant 0 : index
    %2 = vector.load %arg3[%c0_2, %c0_3, %c0_4] : memref<1x8x128xbf16, #tpu.memory_space<vmem>>, vector<1x8x128xbf16>
    %3 = vector.shape_cast %2 : vector<1x8x128xbf16> to vector<8x128xbf16>
    %c0_5 = arith.constant 0 : index
    %c0_6 = arith.constant 0 : index
    %c0_7 = arith.constant 0 : index
    %4 = vector.load %arg4[%c0_5, %c0_6, %c0_7] : memref<1x8x128xbf16, #tpu.memory_space<vmem>>, vector<1x8x128xbf16>
    %5 = vector.shape_cast %4 : vector<1x8x128xbf16> to vector<8x128xbf16>
    %6 = vector.extract_strided_slice %1 {offsets = [0, 0], sizes = [8, 32], strides = [1, 1]} : vector<8x128xbf16> to vector<8x32xbf16>
    %7 = vector.extract_strided_slice %3 {offsets = [0, 0], sizes = [8, 32], strides = [1, 1]} : vector<8x128xbf16> to vector<8x32xbf16>
    %cst = arith.constant dense<0.000000e+00> : vector<8x8xf32>
    %8 = tpu.matmul %6, %7, %cst {dimension_numbers = #tpu.dot_dimension_numbers<[1], [1], [0], [0], [0, 0, 1, 0], [], []>} : vector<8x32xbf16>, vector<8x32xbf16>, vector<8x8xf32> -> vector<8x8xf32>
    %cst_8 = arith.constant dense<0xFF800000> : vector<8xf32>
    %9 = vector.multi_reduction <maximumf>, %8, %cst_8 [1] : vector<8x8xf32> to vector<8xf32>
    %10 = vector.shape_cast %9 : vector<8xf32> to vector<8x1xf32>
    %11 = vector.broadcast %10 : vector<8x1xf32> to vector<8x8xf32>
    %12 = arith.subf %8, %11 : vector<8x8xf32>
    %13 = math.exp %12 : vector<8x8xf32>
    %cst_9 = arith.constant dense<0.000000e+00> : vector<8xf32>
    %14 = vector.multi_reduction <add>, %13, %cst_9 [1] : vector<8x8xf32> to vector<8xf32>
    %15 = vector.shape_cast %14 : vector<8xf32> to vector<8x1xf32>
    %16 = arith.truncf %13 : vector<8x8xf32> to vector<8x8xbf16>
    %17 = vector.extract_strided_slice %5 {offsets = [0, 0], sizes = [8, 32], strides = [1, 1]} : vector<8x128xbf16> to vector<8x32xbf16>
    %cst_10 = arith.constant dense<0.000000e+00> : vector<8x32xf32>
    %18 = tpu.matmul %16, %17, %cst_10 {dimension_numbers = #tpu.dot_dimension_numbers<[1], [0], [0], [1], [0, 0, 1, 1], [], []>} : vector<8x8xbf16>, vector<8x32xbf16>, vector<8x32xf32> -> vector<8x32xf32>
    %19 = tpu.reciprocal %15 {approx = true} : vector<8x1xf32> -> vector<8x1xf32>
    %20 = vector.broadcast %19 : vector<8x1xf32> to vector<8x32xf32>
    %21 = arith.mulf %18, %20 : vector<8x32xf32>
    %22 = arith.truncf %21 : vector<8x32xf32> to vector<8x32xbf16>
    %c0_11 = arith.constant 0 : index
    %c0_12 = arith.constant 0 : index
    %c0_13 = arith.constant 0 : index
    %23 = vector.load %arg5[%c0_11, %c0_12, %c0_13] : memref<1x8x128xbf16, #tpu.memory_space<vmem>>, vector<1x8x32xbf16>
    %24 = vector.shape_cast %23 : vector<1x8x32xbf16> to vector<8x32xbf16>
    %25 = vector.shape_cast %22 : vector<8x32xbf16> to vector<1x8x32xbf16>
    tpu.vector_store %arg5[%c0_11, %c0_12, %c0_13], %25 {strides = array<i32>} : memref<1x8x128xbf16, #tpu.memory_space<vmem>>, vector<1x8x32xbf16>,
    %26 = vector.extract_strided_slice %1 {offsets = [0, 32], sizes = [8, 32], strides = [1, 1]} : vector<8x128xbf16> to vector<8x32xbf16>
    %27 = vector.extract_strided_slice %3 {offsets = [0, 32], sizes = [8, 32], strides = [1, 1]} : vector<8x128xbf16> to vector<8x32xbf16>
    %cst_14 = arith.constant dense<0.000000e+00> : vector<8x8xf32>
    %28 = tpu.matmul %26, %27, %cst_14 {dimension_numbers = #tpu.dot_dimension_numbers<[1], [1], [0], [0], [0, 0, 1, 0], [], []>} : vector<8x32xbf16>, vector<8x32xbf16>, vector<8x8xf32> -> vector<8x8xf32>
    %cst_15 = arith.constant dense<0xFF800000> : vector<8xf32>
    %29 = vector.multi_reduction <maximumf>, %28, %cst_15 [1] : vector<8x8xf32> to vector<8xf32>
    %30 = vector.shape_cast %29 : vector<8xf32> to vector<8x1xf32>
    %31 = vector.broadcast %30 : vector<8x1xf32> to vector<8x8xf32>
    %32 = arith.subf %28, %31 : vector<8x8xf32>
    %33 = math.exp %32 : vector<8x8xf32>
    %cst_16 = arith.constant dense<0.000000e+00> : vector<8xf32>
    %34 = vector.multi_reduction <add>, %33, %cst_16 [1] : vector<8x8xf32> to vector<8xf32>
    %35 = vector.shape_cast %34 : vector<8xf32> to vector<8x1xf32>
    %36 = arith.truncf %33 : vector<8x8xf32> to vector<8x8xbf16>
    %37 = vector.extract_strided_slice %5 {offsets = [0, 32], sizes = [8, 32], strides = [1, 1]} : vector<8x128xbf16> to vector<8x32xbf16>
    %cst_17 = arith.constant dense<0.000000e+00> : vector<8x32xf32>
    %38 = tpu.matmul %36, %37, %cst_17 {dimension_numbers = #tpu.dot_dimension_numbers<[1], [0], [0], [1], [0, 0, 1, 1], [], []>} : vector<8x8xbf16>, vector<8x32xbf16>, vector<8x32xf32> -> vector<8x32xf32>
    %39 = tpu.reciprocal %35 {approx = true} : vector<8x1xf32> -> vector<8x1xf32>
    %40 = vector.broadcast %39 : vector<8x1xf32> to vector<8x32xf32>
    %41 = arith.mulf %38, %40 : vector<8x32xf32>
    %42 = arith.truncf %41 : vector<8x32xf32> to vector<8x32xbf16>
    %c0_18 = arith.constant 0 : index
    %c0_19 = arith.constant 0 : index
    %c32 = arith.constant 32 : index
    %43 = vector.load %arg5[%c0_18, %c0_19, %c32] : memref<1x8x128xbf16, #tpu.memory_space<vmem>>, vector<1x8x32xbf16>
    %44 = vector.shape_cast %43 : vector<1x8x32xbf16> to vector<8x32xbf16>
    %45 = vector.shape_cast %42 : vector<8x32xbf16> to vector<1x8x32xbf16>
    tpu.vector_store %arg5[%c0_18, %c0_19, %c32], %45 {strides = array<i32>} : memref<1x8x128xbf16, #tpu.memory_space<vmem>>, vector<1x8x32xbf16>,
    %46 = vector.extract_strided_slice %1 {offsets = [0, 64], sizes = [8, 32], strides = [1, 1]} : vector<8x128xbf16> to vector<8x32xbf16>
    %47 = vector.extract_strided_slice %3 {offsets = [0, 64], sizes = [8, 32], strides = [1, 1]} : vector<8x128xbf16> to vector<8x32xbf16>
    %cst_20 = arith.constant dense<0.000000e+00> : vector<8x8xf32>
    %48 = tpu.matmul %46, %47, %cst_20 {dimension_numbers = #tpu.dot_dimension_numbers<[1], [1], [0], [0], [0, 0, 1, 0], [], []>} : vector<8x32xbf16>, vector<8x32xbf16>, vector<8x8xf32> -> vector<8x8xf32>
    %cst_21 = arith.constant dense<0xFF800000> : vector<8xf32>
    %49 = vector.multi_reduction <maximumf>, %48, %cst_21 [1] : vector<8x8xf32> to vector<8xf32>
    %50 = vector.shape_cast %49 : vector<8xf32> to vector<8x1xf32>
    %51 = vector.broadcast %50 : vector<8x1xf32> to vector<8x8xf32>
    %52 = arith.subf %48, %51 : vector<8x8xf32>
    %53 = math.exp %52 : vector<8x8xf32>
    %cst_22 = arith.constant dense<0.000000e+00> : vector<8xf32>
    %54 = vector.multi_reduction <add>, %53, %cst_22 [1] : vector<8x8xf32> to vector<8xf32>
    %55 = vector.shape_cast %54 : vector<8xf32> to vector<8x1xf32>
    %56 = arith.truncf %53 : vector<8x8xf32> to vector<8x8xbf16>
    %57 = vector.extract_strided_slice %5 {offsets = [0, 64], sizes = [8, 32], strides = [1, 1]} : vector<8x128xbf16> to vector<8x32xbf16>
    %cst_23 = arith.constant dense<0.000000e+00> : vector<8x32xf32>
    %58 = tpu.matmul %56, %57, %cst_23 {dimension_numbers = #tpu.dot_dimension_numbers<[1], [0], [0], [1], [0, 0, 1, 1], [], []>} : vector<8x8xbf16>, vector<8x32xbf16>, vector<8x32xf32> -> vector<8x32xf32>
    %59 = tpu.reciprocal %55 {approx = true} : vector<8x1xf32> -> vector<8x1xf32>
    %60 = vector.broadcast %59 : vector<8x1xf32> to vector<8x32xf32>
    %61 = arith.mulf %58, %60 : vector<8x32xf32>
    %62 = arith.truncf %61 : vector<8x32xf32> to vector<8x32xbf16>
    %c0_24 = arith.constant 0 : index
    %c0_25 = arith.constant 0 : index
    %c64 = arith.constant 64 : index
    %63 = vector.load %arg5[%c0_24, %c0_25, %c64] : memref<1x8x128xbf16, #tpu.memory_space<vmem>>, vector<1x8x32xbf16>
    %64 = vector.shape_cast %63 : vector<1x8x32xbf16> to vector<8x32xbf16>
    %65 = vector.shape_cast %62 : vector<8x32xbf16> to vector<1x8x32xbf16>
    tpu.vector_store %arg5[%c0_24, %c0_25, %c64], %65 {strides = array<i32>} : memref<1x8x128xbf16, #tpu.memory_space<vmem>>, vector<1x8x32xbf16>,
    %66 = vector.extract_strided_slice %1 {offsets = [0, 96], sizes = [8, 32], strides = [1, 1]} : vector<8x128xbf16> to vector<8x32xbf16>
    %67 = vector.extract_strided_slice %3 {offsets = [0, 96], sizes = [8, 32], strides = [1, 1]} : vector<8x128xbf16> to vector<8x32xbf16>
    %cst_26 = arith.constant dense<0.000000e+00> : vector<8x8xf32>
    %68 = tpu.matmul %66, %67, %cst_26 {dimension_numbers = #tpu.dot_dimension_numbers<[1], [1], [0], [0], [0, 0, 1, 0], [], []>} : vector<8x32xbf16>, vector<8x32xbf16>, vector<8x8xf32> -> vector<8x8xf32>
    %cst_27 = arith.constant dense<0xFF800000> : vector<8xf32>
    %69 = vector.multi_reduction <maximumf>, %68, %cst_27 [1] : vector<8x8xf32> to vector<8xf32>
    %70 = vector.shape_cast %69 : vector<8xf32> to vector<8x1xf32>
    %71 = vector.broadcast %70 : vector<8x1xf32> to vector<8x8xf32>
    %72 = arith.subf %68, %71 : vector<8x8xf32>
    %73 = math.exp %72 : vector<8x8xf32>
    %cst_28 = arith.constant dense<0.000000e+00> : vector<8xf32>
    %74 = vector.multi_reduction <add>, %73, %cst_28 [1] : vector<8x8xf32> to vector<8xf32>
    %75 = vector.shape_cast %74 : vector<8xf32> to vector<8x1xf32>
    %76 = arith.truncf %73 : vector<8x8xf32> to vector<8x8xbf16>
    %77 = vector.extract_strided_slice %5 {offsets = [0, 96], sizes = [8, 32], strides = [1, 1]} : vector<8x128xbf16> to vector<8x32xbf16>
    %cst_29 = arith.constant dense<0.000000e+00> : vector<8x32xf32>
    %78 = tpu.matmul %76, %77, %cst_29 {dimension_numbers = #tpu.dot_dimension_numbers<[1], [0], [0], [1], [0, 0, 1, 1], [], []>} : vector<8x8xbf16>, vector<8x32xbf16>, vector<8x32xf32> -> vector<8x32xf32>
    %79 = tpu.reciprocal %75 {approx = true} : vector<8x1xf32> -> vector<8x1xf32>
    %80 = vector.broadcast %79 : vector<8x1xf32> to vector<8x32xf32>
    %81 = arith.mulf %78, %80 : vector<8x32xf32>
    %82 = arith.truncf %81 : vector<8x32xf32> to vector<8x32xbf16>
    %c0_30 = arith.constant 0 : index
    %c0_31 = arith.constant 0 : index
    %c96 = arith.constant 96 : index
    %83 = vector.load %arg5[%c0_30, %c0_31, %c96] : memref<1x8x128xbf16, #tpu.memory_space<vmem>>, vector<1x8x32xbf16>
    %84 = vector.shape_cast %83 : vector<1x8x32xbf16> to vector<8x32xbf16>
    %85 = vector.shape_cast %82 : vector<8x32xbf16> to vector<1x8x32xbf16>
    tpu.vector_store %arg5[%c0_30, %c0_31, %c96], %85 {strides = array<i32>} : memref<1x8x128xbf16, #tpu.memory_space<vmem>>, vector<1x8x32xbf16>,
    return
  }
  func.func @transform_0(%arg0: i32, %arg1: i32) -> (i32, i32, i32) {
    %c0_i32 = arith.constant 0 : i32
    %c0_i32_0 = arith.constant 0 : i32
    return %arg0, %arg1, %c0_i32 : i32, i32, i32
  }
  func.func @transform_1(%arg0: i32, %arg1: i32) -> (i32, i32, i32) {
    %c0_i32 = arith.constant 0 : i32
    %c0_i32_0 = arith.constant 0 : i32
    %c0_i32_1 = arith.constant 0 : i32
    return %arg0, %c0_i32, %c0_i32_0 : i32, i32, i32
  }
  func.func @transform_2(%arg0: i32, %arg1: i32) -> (i32, i32, i32) {
    %c0_i32 = arith.constant 0 : i32
    %c1_i32 = arith.constant 1 : i32
    %c0_i32_0 = arith.constant 0 : i32
    return %arg0, %c0_i32, %c1_i32 : i32, i32, i32
  }
  func.func @transform_3(%arg0: i32, %arg1: i32) -> (i32, i32, i32) {
    %c0_i32 = arith.constant 0 : i32
    %c0_i32_0 = arith.constant 0 : i32
    return %arg0, %arg1, %c0_i32 : i32, i32, i32
  }
}

module attributes {stable_mosaic.version = 11 : i64} {
  func.func @_ffn_kernel(%arg0: i32, %arg1: i32, %arg2: memref<16x128xbf16, #tpu.memory_space<vmem>>, %arg3: memref<1x128xbf16, #tpu.memory_space<vmem>>, %arg4: memref<1x128xbf16, #tpu.memory_space<vmem>>, %arg5: memref<128x512xbf16, #tpu.memory_space<vmem>>, %arg6: memref<1x512xbf16, #tpu.memory_space<vmem>>, %arg7: memref<512x128xbf16, #tpu.memory_space<vmem>>, %arg8: memref<1x128xbf16, #tpu.memory_space<vmem>>, %arg9: memref<16x128xbf16, #tpu.memory_space<vmem>>, %arg10: memref<16x128xbf16, #tpu.memory_space<vmem>>, %arg11: memref<16x128xf32, #tpu.memory_space<vmem>>) attributes {dimension_semantics = [#tpu.dimension_semantics<parallel>, #tpu.dimension_semantics<arbitrary>], iteration_bounds = array<i64: 1, 1>, scalar_prefetch = 0 : i64, scratch_operands = 2 : i64, tpu.core_type = #tpu.core_type<tc>, window_params = [{transform_indices = @transform_0, window_bounds = array<i64: 16, 128>}, {pipeline_mode = #tpu.pipeline_mode<synchronous>, transform_indices = @transform_1, window_bounds = array<i64: 1, 128>}, {pipeline_mode = #tpu.pipeline_mode<synchronous>, transform_indices = @transform_2, window_bounds = array<i64: 1, 128>}, {transform_indices = @transform_3, window_bounds = array<i64: 128, 512>}, {transform_indices = @transform_4, window_bounds = array<i64: 1, 512>}, {transform_indices = @transform_5, window_bounds = array<i64: 512, 128>}, {pipeline_mode = #tpu.pipeline_mode<synchronous>, transform_indices = @transform_6, window_bounds = array<i64: 1, 128>}, {transform_indices = @transform_7, window_bounds = array<i64: 16, 128>}]} {
    %c0_i32 = arith.constant 0 : i32
    %0 = arith.cmpi eq, %arg1, %c0_i32 : i32
    %1 = arith.extui %0 : i1 to i32
    %c0_i32_0 = arith.constant 0 : i32
    %2 = arith.cmpi ne, %1, %c0_i32_0 : i32
    scf.if %2 {
      %c0_16 = arith.constant 0 : index
      %c0_17 = arith.constant 0 : index
      %21 = vector.load %arg2[%c0_16, %c0_17] : memref<16x128xbf16, #tpu.memory_space<vmem>>, vector<16x128xbf16>
      %22 = arith.extf %21 : vector<16x128xbf16> to vector<16x128xf32>
      %cst_18 = arith.constant dense<0.000000e+00> : vector<16xf32>
      %23 = vector.multi_reduction <add>, %22, %cst_18 [1] : vector<16x128xf32> to vector<16xf32>
      %24 = vector.shape_cast %23 : vector<16xf32> to vector<16x1xf32>
      %cst_19 = arith.constant 1.280000e+02 : f32
      %25 = vector.broadcast %cst_19 : f32 to vector<16x1xf32>
      %26 = arith.divf %24, %25 : vector<16x1xf32>
      %27 = vector.broadcast %26 : vector<16x1xf32> to vector<16x128xf32>
      %28 = arith.subf %22, %27 : vector<16x128xf32>
      %29 = arith.mulf %28, %28 : vector<16x128xf32>
      %cst_20 = arith.constant dense<0.000000e+00> : vector<16xf32>
      %30 = vector.multi_reduction <add>, %29, %cst_20 [1] : vector<16x128xf32> to vector<16xf32>
      %31 = vector.shape_cast %30 : vector<16xf32> to vector<16x1xf32>
      %cst_21 = arith.constant 1.280000e+02 : f32
      %32 = vector.broadcast %cst_21 : f32 to vector<16x1xf32>
      %33 = arith.divf %31, %32 : vector<16x1xf32>
      %34 = vector.broadcast %26 : vector<16x1xf32> to vector<16x128xf32>
      %35 = arith.subf %22, %34 : vector<16x128xf32>
      %cst_22 = arith.constant 9.99999974E-6 : f32
      %36 = vector.broadcast %cst_22 : f32 to vector<16x1xf32>
      %37 = arith.addf %33, %36 : vector<16x1xf32>
      %38 = math.rsqrt %37 : vector<16x1xf32>
      %39 = vector.broadcast %38 : vector<16x1xf32> to vector<16x128xf32>
      %40 = arith.mulf %35, %39 : vector<16x128xf32>
      %c0_23 = arith.constant 0 : index
      %c0_24 = arith.constant 0 : index
      %41 = vector.load %arg3[%c0_23, %c0_24] : memref<1x128xbf16, #tpu.memory_space<vmem>>, vector<1x128xbf16>
      %42 = arith.extf %41 : vector<1x128xbf16> to vector<1x128xf32>
      %43 = vector.broadcast %42 : vector<1x128xf32> to vector<16x128xf32>
      %44 = arith.mulf %40, %43 : vector<16x128xf32>
      %c0_25 = arith.constant 0 : index
      %c0_26 = arith.constant 0 : index
      %45 = vector.load %arg4[%c0_25, %c0_26] : memref<1x128xbf16, #tpu.memory_space<vmem>>, vector<1x128xbf16>
      %46 = arith.extf %45 : vector<1x128xbf16> to vector<1x128xf32>
      %47 = vector.broadcast %46 : vector<1x128xf32> to vector<16x128xf32>
      %48 = arith.addf %44, %47 : vector<16x128xf32>
      %49 = arith.truncf %48 : vector<16x128xf32> to vector<16x128xbf16>
      %c0_27 = arith.constant 0 : index
      %c0_28 = arith.constant 0 : index
      %50 = vector.load %arg10[%c0_27, %c0_28] : memref<16x128xbf16, #tpu.memory_space<vmem>>, vector<16x128xbf16>
      tpu.vector_store %arg10[%c0_27, %c0_28], %49 {strides = array<i32>} : memref<16x128xbf16, #tpu.memory_space<vmem>>, vector<16x128xbf16>,
      %cst_29 = arith.constant 0.000000e+00 : f32
      %51 = vector.broadcast %cst_29 : f32 to vector<16x128xf32>
      %c0_30 = arith.constant 0 : index
      %c0_31 = arith.constant 0 : index
      %52 = vector.load %arg11[%c0_30, %c0_31] : memref<16x128xf32, #tpu.memory_space<vmem>>, vector<16x128xf32>
      tpu.vector_store %arg11[%c0_30, %c0_31], %51 {strides = array<i32>} : memref<16x128xf32, #tpu.memory_space<vmem>>, vector<16x128xf32>,
    } else {
    }
    %c0 = arith.constant 0 : index
    %c0_1 = arith.constant 0 : index
    %3 = vector.load %arg10[%c0, %c0_1] : memref<16x128xbf16, #tpu.memory_space<vmem>>, vector<16x128xbf16>
    %c0_2 = arith.constant 0 : index
    %c0_3 = arith.constant 0 : index
    %4 = vector.load %arg5[%c0_2, %c0_3] : memref<128x512xbf16, #tpu.memory_space<vmem>>, vector<128x512xbf16>
    %cst = arith.constant dense<0.000000e+00> : vector<16x512xf32>
    %5 = tpu.matmul %3, %4, %cst {dimension_numbers = #tpu.dot_dimension_numbers<[1], [0], [0], [1], [0, 0, 1, 1], [], []>} : vector<16x128xbf16>, vector<128x512xbf16>, vector<16x512xf32> -> vector<16x512xf32>
    %c0_4 = arith.constant 0 : index
    %c0_5 = arith.constant 0 : index
    %6 = vector.load %arg6[%c0_4, %c0_5] : memref<1x512xbf16, #tpu.memory_space<vmem>>, vector<1x512xbf16>
    %7 = arith.extf %6 : vector<1x512xbf16> to vector<1x512xf32>
    %8 = vector.broadcast %7 : vector<1x512xf32> to vector<16x512xf32>
    %9 = arith.addf %5, %8 : vector<16x512xf32>
    %cst_6 = arith.constant 0.000000e+00 : f32
    %10 = vector.broadcast %cst_6 : f32 to vector<16x512xf32>
    %11 = arith.maximumf %9, %10 : vector<16x512xf32>
    %c0_7 = arith.constant 0 : index
    %c0_8 = arith.constant 0 : index
    %12 = vector.load %arg11[%c0_7, %c0_8] : memref<16x128xf32, #tpu.memory_space<vmem>>, vector<16x128xf32>
    %13 = arith.truncf %11 : vector<16x512xf32> to vector<16x512xbf16>
    %c0_9 = arith.constant 0 : index
    %c0_10 = arith.constant 0 : index
    %14 = vector.load %arg7[%c0_9, %c0_10] : memref<512x128xbf16, #tpu.memory_space<vmem>>, vector<512x128xbf16>
    %cst_11 = arith.constant dense<0.000000e+00> : vector<16x128xf32>
    %15 = tpu.matmul %13, %14, %cst_11 {dimension_numbers = #tpu.dot_dimension_numbers<[1], [0], [0], [1], [0, 0, 1, 1], [], []>} : vector<16x512xbf16>, vector<512x128xbf16>, vector<16x128xf32> -> vector<16x128xf32>
    %16 = arith.addf %12, %15 : vector<16x128xf32>
    %c0_12 = arith.constant 0 : index
    %c0_13 = arith.constant 0 : index
    %17 = vector.load %arg11[%c0_12, %c0_13] : memref<16x128xf32, #tpu.memory_space<vmem>>, vector<16x128xf32>
    tpu.vector_store %arg11[%c0_12, %c0_13], %16 {strides = array<i32>} : memref<16x128xf32, #tpu.memory_space<vmem>>, vector<16x128xf32>,
    %c0_i32_14 = arith.constant 0 : i32
    %18 = arith.cmpi eq, %arg1, %c0_i32_14 : i32
    %19 = arith.extui %18 : i1 to i32
    %c0_i32_15 = arith.constant 0 : i32
    %20 = arith.cmpi ne, %19, %c0_i32_15 : i32
    scf.if %20 {
      %c0_16 = arith.constant 0 : index
      %c0_17 = arith.constant 0 : index
      %21 = vector.load %arg11[%c0_16, %c0_17] : memref<16x128xf32, #tpu.memory_space<vmem>>, vector<16x128xf32>
      %c0_18 = arith.constant 0 : index
      %c0_19 = arith.constant 0 : index
      %22 = vector.load %arg8[%c0_18, %c0_19] : memref<1x128xbf16, #tpu.memory_space<vmem>>, vector<1x128xbf16>
      %23 = arith.extf %22 : vector<1x128xbf16> to vector<1x128xf32>
      %24 = vector.broadcast %23 : vector<1x128xf32> to vector<16x128xf32>
      %25 = arith.addf %21, %24 : vector<16x128xf32>
      %c0_20 = arith.constant 0 : index
      %c0_21 = arith.constant 0 : index
      %26 = vector.load %arg2[%c0_20, %c0_21] : memref<16x128xbf16, #tpu.memory_space<vmem>>, vector<16x128xbf16>
      %27 = arith.extf %26 : vector<16x128xbf16> to vector<16x128xf32>
      %28 = arith.addf %25, %27 : vector<16x128xf32>
      %29 = arith.truncf %28 : vector<16x128xf32> to vector<16x128xbf16>
      %c0_22 = arith.constant 0 : index
      %c0_23 = arith.constant 0 : index
      %30 = vector.load %arg9[%c0_22, %c0_23] : memref<16x128xbf16, #tpu.memory_space<vmem>>, vector<16x128xbf16>
      tpu.vector_store %arg9[%c0_22, %c0_23], %29 {strides = array<i32>} : memref<16x128xbf16, #tpu.memory_space<vmem>>, vector<16x128xbf16>,
    } else {
    }
    return
  }
  func.func @transform_0(%arg0: i32, %arg1: i32) -> (i32, i32) {
    %c0_i32 = arith.constant 0 : i32
    %c0_i32_0 = arith.constant 0 : i32
    return %arg0, %c0_i32 : i32, i32
  }
  func.func @transform_1(%arg0: i32, %arg1: i32) -> (i32, i32) {
    %c0_i32 = arith.constant 0 : i32
    %c0_i32_0 = arith.constant 0 : i32
    %c0_i32_1 = arith.constant 0 : i32
    return %c0_i32, %c0_i32_0 : i32, i32
  }
  func.func @transform_2(%arg0: i32, %arg1: i32) -> (i32, i32) {
    %c0_i32 = arith.constant 0 : i32
    %c0_i32_0 = arith.constant 0 : i32
    %c0_i32_1 = arith.constant 0 : i32
    return %c0_i32, %c0_i32_0 : i32, i32
  }
  func.func @transform_3(%arg0: i32, %arg1: i32) -> (i32, i32) {
    %c0_i32 = arith.constant 0 : i32
    %c0_i32_0 = arith.constant 0 : i32
    return %c0_i32, %arg1 : i32, i32
  }
  func.func @transform_4(%arg0: i32, %arg1: i32) -> (i32, i32) {
    %c0_i32 = arith.constant 0 : i32
    %c0_i32_0 = arith.constant 0 : i32
    return %c0_i32, %arg1 : i32, i32
  }
  func.func @transform_5(%arg0: i32, %arg1: i32) -> (i32, i32) {
    %c0_i32 = arith.constant 0 : i32
    %c0_i32_0 = arith.constant 0 : i32
    return %arg1, %c0_i32 : i32, i32
  }
  func.func @transform_6(%arg0: i32, %arg1: i32) -> (i32, i32) {
    %c0_i32 = arith.constant 0 : i32
    %c0_i32_0 = arith.constant 0 : i32
    %c0_i32_1 = arith.constant 0 : i32
    return %c0_i32, %c0_i32_0 : i32, i32
  }
  func.func @transform_7(%arg0: i32, %arg1: i32) -> (i32, i32) {
    %c0_i32 = arith.constant 0 : i32
    %c0_i32_0 = arith.constant 0 : i32
    return %arg0, %c0_i32 : i32, i32
  }
}

</mosaic_0001>

<bundles_post_ra>
// kernel: transformer_decoder_block.10
= control target key start
LH: loop header
LB: loop body
LE: loop exit
PB: predicated region body
PF: predicated region fallthrough
CT: control target
= control target key end

     0   :  { %v227_v0 = vmov 0.0   ;;  %vm228_vm0 = vmmov 0   ;;  %s282_s1 = inlined_call_operand.vmem [shape: bf16[128,128], index: 1, kind: input, shape index: {}]   ;;  %s283_s0 = inlined_call_operand.vmem [shape: bf16[16,128], index: 0, kind: input, shape index: {}]   ;;  %s284_s2 = inlined_call_operand.vmem [shape: bf16[16,128], index: 2, kind: input, shape index: {}]   ;;  %s285_s3 = inlined_call_operand.vmem [shape: bf16[16,128], index: 3, kind: output, shape index: {}]  }
   0x1   :  { %196 = vmatprep.subr.bf16.mxu0 %v227_v0  ;;  %v218_v1 = vld [vmem:[%s282_s1] sm:$0xff]   ;;  %212 = vmatprep.mubr.msk.bf16.mxu0 %vm228_vm0, %v227_v0  ;;  %v219_v2 = vld [vmem:[%s282_s1 + $0x8] sm:$0xff]   ;;  %v220_v3 = vld [vmem:[%s282_s1 + $0x10] sm:$0xff]  }
   0x2   :  { %197 = vmatpush3.bf16.msra.mxu0 %v218_v1  ;;  %v221_v4 = vld [vmem:[%s282_s1 + $0x18] sm:$0xff]   ;;  %v222_v5 = vld [vmem:[%s282_s1 + $0x20] sm:$0xff]   ;;  %v223_v6 = vld [vmem:[%s282_s1 + $0x28] sm:$0xff]  }
   0x3   :  { %198 = vmatprep.subr.bf16.mxu0 %v227_v0  ;;  %v224_v7 = vld [vmem:[%s282_s1 + $0x30] sm:$0xff]   ;;  %v225_v8 = vld [vmem:[%s282_s1 + $0x38] sm:$0xff]   ;;  %v226_v9 = vld [vmem:[%s283_s0] sm:$0xff]  }
   0x4   :  { %v179_v10 = vld [vmem:[%s284_s2] sm:$0xff]  }
   0x5   :  { %v180_v11 = vunpack.c.l.bf16 %v179_v10  ;;  %v181_v12 = vunpack.c.h.bf16 %v179_v10 }
   0x6   :  { %199 = vmatpush3.bf16.msra.mxu0 %v219_v2 }
   0x7   :  { %200 = vmatprep.subr.bf16.mxu0 %v227_v0 }
   0xa   :  { %201 = vmatpush3.bf16.msra.mxu0 %v220_v3 }
   0xb   :  { %202 = vmatprep.subr.bf16.mxu0 %v227_v0 }
   0xe   :  { %203 = vmatpush3.bf16.msra.mxu0 %v221_v4 }
   0xf   :  { %204 = vmatprep.subr.bf16.mxu0 %v227_v0 }
  0x12   :  { %205 = vmatpush3.bf16.msra.mxu0 %v222_v5 }
  0x13   :  { %206 = vmatprep.subr.bf16.mxu0 %v227_v0 }
  0x16   :  { %207 = vmatpush3.bf16.msra.mxu0 %v223_v6 }
  0x17   :  { %208 = vmatprep.subr.bf16.mxu0 %v227_v0 }
  0x1a   :  { %209 = vmatpush3.bf16.msra.mxu0 %v224_v7 }
  0x1b   :  { %210 = vmatprep.subr.bf16.mxu0 %v227_v0 }
  0x1e   :  { %211 = vmatpush3.bf16.msra.mxu0 %v225_v8 }
  0x21   :  { %213 = vmatmul.mubr.bf16.vlgmr.msra.gmra.mrb[0].mxu0 %v226_v9 }
  0xf4   :  { %v129_v13 = vpop.f32.mrb[0].mxu0 }
  0xf5   :  { %v214_v14 = vpop.f32.mrb[1].mxu0  ;;  %v149_v16 = vadd.f32 %v180_v11, %v129_v13 }
  0xf6   :  { %v132_v15 = vpop.f32.mrb[2].mxu0 }
  0xf7   :  { %v150_v17 = vadd.f32 %v181_v12, %v132_v15  ;;  %v215_v18 = vpop.f32.mrb[3].mxu0 }
  0xf9   :  { %v185_v19 = vpack.c.bf16 %v150_v17, %v149_v16 }
  0xfb   :  { %186 = vst [vmem:[%s285_s3] sm:$0xff] %v185_v19  }

// kernel: transformer_decoder_block.11
= control target key start
LH: loop header
LB: loop body
LE: loop exit
PB: predicated region body
PF: predicated region fallthrough
CT: control target
= control target key end

     0   :  { %v251_v3 = vmov 0.0   ;;  %vm252_vm0 = vmmov 0   ;;  %v51_v24 = vlaneseq  ;;  %s314_s0 = inlined_call_operand.vmem [shape: bf16[16,128], index: 0, kind: input, shape index: {}]   ;;  %s315_s3 = inlined_call_operand.vmem [shape: bf16[128,128], index: 3, kind: input, shape index: {}]   ;;  %s316_s1 = inlined_call_operand.vmem [shape: bf16[1,128], index: 1, kind: input, shape index: {}]   ;;  %s317_s2 = inlined_call_operand.vmem [shape: bf16[1,128], index: 2, kind: input, shape index: {}]   ;;  %s318_s4 = inlined_call_operand.vmem [shape: bf16[16,128], index: 4, kind: output, shape index: {}]  }
   0x1   :  { %v200_v0 = vld [vmem:[%s314_s0] sm:$0xff]   ;;  %217 = vmatprep.subr.bf16.mxu0 %v251_v3  ;;  %v240_v13 = vld [vmem:[%s315_s3 + $0x8] sm:$0xff]   ;;  %v241_v14 = vld [vmem:[%s315_s3 + $0x10] sm:$0xff]   ;;  %233 = vmatprep.mubr.msk.bf16.mxu0 %vm252_vm0, %v251_v3 }
   0x2   :  { %v201_v1 = vunpack.c.l.bf16 %v200_v0  ;;  %v202_v2 = vunpack.c.h.bf16 %v200_v0  ;;  %v239_v4 = vld [vmem:[%s315_s3] sm:$0xff]   ;;  %v242_v15 = vld [vmem:[%s315_s3 + $0x18] sm:$0xff]   ;;  %v244_v17 = vld [vmem:[%s315_s3 + $0x28] sm:$0xff]   ;;  %v52_v27 = vshrl.u32 %v51_v24, 7 }
   0x3   :  { %218 = vmatpush3.bf16.msra.mxu0 %v239_v4  ;;  %v243_v16 = vld [vmem:[%s315_s3 + $0x20] sm:$0xff]   ;;  %v245_v18 = vld [vmem:[%s315_s3 + $0x30] sm:$0xff]   ;;  %v246_v19 = vld [vmem:[%s315_s3 + $0x38] sm:$0xff]  }
   0x4   :  { %26 = vadd.xlane.f32.xlu0 %v201_v1  ;;  %219 = vmatprep.subr.bf16.mxu0 %v251_v3  ;;  %v49_v28 = vld [vmem:[%s316_s1] sm:$0x1]  ;;  %v53_v30 = vsub.s32 0, %v52_v27 }
   0x5   :  { %v50_v29 = vunpack.c.l.bf16 %v49_v28  ;;  %v57_v31 = vld [vmem:[%s317_s2] sm:$0x1] }
   0x6   :  { %v58_v35 = vunpack.c.l.bf16 %v57_v31 }
   0x7   :  { %220 = vmatpush3.bf16.msra.mxu0 %v240_v13  ;;  %v54_v34 = vrot.slane %v50_v29, %v53_v30 }
   0x8   :  { %28 = vadd.xlane.f32.xlu0 %v202_v2  ;;  %221 = vmatprep.subr.bf16.mxu0 %v251_v3  ;;  %v62_v39 = vrot.slane %v58_v35, %v53_v30 }
   0xb   :  { %222 = vmatpush3.bf16.msra.mxu0 %v241_v14 }
   0xc   :  { %223 = vmatprep.subr.bf16.mxu0 %v251_v3 }
   0xf   :  { %224 = vmatpush3.bf16.msra.mxu0 %v242_v15 }
  0x10   :  { %225 = vmatprep.subr.bf16.mxu0 %v251_v3 }
  0x13   :  { %226 = vmatpush3.bf16.msra.mxu0 %v243_v16 }
  0x14   :  { %227 = vmatprep.subr.bf16.mxu0 %v251_v3 }
  0x17   :  { %228 = vmatpush3.bf16.msra.mxu0 %v244_v17 }
  0x18   :  { %229 = vmatprep.subr.bf16.mxu0 %v251_v3 }
  0x1b   :  { %230 = vmatpush3.bf16.msra.mxu0 %v245_v18 }
  0x1c   :  { %231 = vmatprep.subr.bf16.mxu0 %v251_v3 }
  0x1f   :  { %232 = vmatpush3.bf16.msra.mxu0 %v246_v19 }
  0x91   :  { %v27_v5 = vpop.xlane.xlu0 %26 }
  0x92   :  { %v31_v6 = vmul.f32 0.0078125, %v27_v5 }
  0x94   :  { %v33_v7 = vsub.f32 %v201_v1, %v31_v6 }
  0x95   :  { %v29_v8 = vpop.xlane.xlu0 %28 }
  0x96   :  { %v32_v9 = vmul.f32 0.0078125, %v29_v8  ;;  %v35_v10 = vmul.f32 %v33_v7, %v33_v7 }
  0x98   :  { %v34_v11 = vsub.f32 %v202_v2, %v32_v9  ;;  %37 = vadd.xlane.f32.xlu1 %v35_v10 }
  0x9a   :  { %v36_v12 = vmul.f32 %v34_v11, %v34_v11 }
  0x9c   :  { %39 = vadd.xlane.f32.xlu1 %v36_v12 }
 0x125   :  { %v38_v20 = vpop.xlane.xlu1 %37 }
 0x126   :  { %v41_v21 = vmul.f32 0.0078125, %v38_v20 }
 0x128   :  { %v43_v22 = vadd.f32 1e-05, %v41_v21 }
 0x129   :  { %v40_v23 = vpop.xlane.xlu1 %39 }
 0x12a   :  { %247 = vrsqrt.f32 %v43_v22  ;;  %v42_v25 = vmul.f32 0.0078125, %v40_v23 }
 0x12c   :  { %v44_v26 = vadd.f32 1e-05, %v42_v25 }
 0x12e   :  { %249 = vrsqrt.f32 %v44_v26 }
 0x134   :  { %v248_v32 = vpop.eup %247 }
 0x135   :  { %v47_v33 = vmul.f32 %v248_v32, %v33_v7 }
 0x137   :  { %v55_v38 = vmul.f32 %v54_v34, %v47_v33 }
 0x138   :  { %v250_v36 = vpop.eup %249 }
 0x139   :  { %v48_v37 = vmul.f32 %v250_v36, %v34_v11  ;;  %v63_v41 = vadd.f32 %v62_v39, %v55_v38 }
 0x13b   :  { %v56_v40 = vmul.f32 %v54_v34, %v48_v37 }
 0x13d   :  { %v64_v42 = vadd.f32 %v62_v39, %v56_v40 }
 0x13f   :  { %v65_v43 = vpack.c.bf16 %v64_v42, %v63_v41 }
 0x141   :  { %234 = vmatmul.mubr.bf16.vlgmr.msra.gmra.mrb[0].mxu0 %v65_v43 }
 0x214   :  { %v166_v44 = vpop.f32.mrb[0].mxu0 }
 0x215   :  { %v235_v45 = vpop.f32.mrb[1].mxu0 }
 0x216   :  { %v169_v46 = vpop.f32.mrb[2].mxu0 }
 0x217   :  { %v206_v47 = vpack.c.bf16 %v169_v46, %v166_v44  ;;  %v236_v48 = vpop.f32.mrb[3].mxu0 }
 0x219   :  { %207 = vst [vmem:[%s318_s4] sm:$0xff] %v206_v47  }

// kernel: transformer_decoder_block.8
= control target key start
LH: loop header
LB: loop body
LE: loop exit
PB: predicated region body
PF: predicated region fallthrough
CT: control target
= control target key end

     0   :  { %9 = vsyncpa [#allocation4], 0  ;;  %s486_s15 = smov [#allocation3]   ;;  %s569_s0 = inlined_call_operand.vmem [shape: bf16[16,128], index: 0, kind: input, shape index: {}]   ;;  %s570_s1 = inlined_call_operand.vmem [shape: bf16[1,128], index: 1, kind: input, shape index: {}]   ;;  %s571_s2 = inlined_call_operand.vmem [shape: bf16[1,128], index: 2, kind: input, shape index: {}]   ;;  %s572_s3 = inlined_call_operand.hbm [shape: bf16[128,384], index: 3, kind: input, shape index: {}]   ;;  %s573_s4 = inlined_call_operand.vmem [shape: bf16[16,384], index: 4, kind: output, shape index: {}]  }
   0x1   :  { %s21_s16 = sshll.u32 %s486_s15, 4  ;;  %s462_s19 = scalar_lea.hbm %s572_s3, 3072  ;;  %s22_s16 = int_to_ptr.vmem [resolvable:$true] %s21_s16 }
   0x2   :  { %p463_p0 = scmp.ne.s32.totalorder %s572_s3, %s462_s19  ;;  %p466_p1 = scmp.lt.u32.totalorder %s462_s19, %s572_s3 }
   0x4   :  { %p468_p2 = pnand %p466_p1, %p463_p0 }
   0x6   :  { %471 = shalt.err (!%p468_p2)
}
   0x7   :  { %s472_s24 = scalar_lea.vmem %s22_s16, 3072  ;;  %p477_p4 = scmp.lt.s32.totalorder %s22_s16, %s22_s16 }
   0x8   :  { %p473_p3 = scmp.ne.s32.totalorder %s22_s16, %s472_s24  ;;  %p478_p5 = scmp.lt.s32.totalorder %s472_s24, %s472_s24 }
   0xa   :  { %p479_p6 = por %p478_p5, %p477_p4 }
   0xc   :  { %p480_p7 = pnand %p479_p6, %p473_p3 }
   0xe   :  { %483 = shalt.err (!%p480_p7)
}
   0xf   :  { %s487_s25 = smov 192   ;;  %s488_s26 = smov 12  }
  0x10   :  { %27 = dma.hbm_to_vmem [thread:$0]  %s572_s3, 3072, %s22_s16, [#allocation4], %s487_s25, %s487_s25, %s488_s26  }
  0x11   :  { %484 = dma.done.wait [#allocation4], 3072  }
  0x12   :  { %485 = vsyncadd [#allocation4], 4294964224  ;;  %v388_v0 = vld [vmem:[%s569_s0] sm:$0xff]   ;;  %v489_v5 = vmov 0.0   ;;  %v429_v6 = vld [vmem:[#allocation3 + $0x8] ss:$12 sps:$4 sm:$0xff]   ;;  %v65_v41 = vlaneseq }
  0x13   :  { %v389_v1 = vunpack.c.l.bf16 %v388_v0  ;;  %v390_v2 = vunpack.c.h.bf16 %v388_v0  ;;  %v426_v3 = vld [vmem:[#allocation3 + $0x4] ss:$12 sps:$4 sm:$0xff]   ;;  %v428_v4 = vld [vmem:[#allocation3] ss:$12 sps:$4 sm:$0xff]   ;;  %400 = vmatprep.subr.bf16.mxu1 %v489_v5  ;;  %v430_v7 = vld [vmem:[#allocation3 + $0x1c] ss:$12 sps:$4 sm:$0xff]  }
  0x14   :  { %242 = vmatprep.subr.bf16.mxu0 %v426_v3  ;;  %401 = vmatpush3.bf16.msra.mxu1 %v429_v6  ;;  %v432_v16 = vld [vmem:[#allocation3 + $0x18] ss:$12 sps:$4 sm:$0xff]   ;;  %v433_v17 = vld [vmem:[#allocation3 + $0x20] ss:$12 sps:$4 sm:$0xff]   ;;  %v436_v19 = vld [vmem:[#allocation3 + $0x30] ss:$12 sps:$4 sm:$0xff]  }
  0x15   :  { %40 = vadd.xlane.f32.xlu0 %v389_v1  ;;  %243 = vmatpush1.bf16.msra.mxu0 %v428_v4  ;;  %v434_v18 = vld [vmem:[#allocation3 + $0x34] ss:$12 sps:$4 sm:$0xff]   ;;  %v437_v20 = vld [vmem:[#allocation3 + $0x38] ss:$12 sps:$4 sm:$0xff]   ;;  %v441_v23 = vld [vmem:[#allocation3 + $0x50] ss:$12 sps:$4 sm:$0xff]  }
  0x16   :  { %244 = vmatprep.subr.bf16.mxu0 %v430_v7  ;;  %402 = vmatprep.subr.bf16.mxu1 %v489_v5  ;;  %v438_v21 = vld [vmem:[#allocation3 + $0x4c] ss:$12 sps:$4 sm:$0xff]   ;;  %v440_v22 = vld [vmem:[#allocation3 + $0x48] ss:$12 sps:$4 sm:$0xff]   ;;  %v442_v24 = vld [vmem:[#allocation3 + $0x64] ss:$12 sps:$4 sm:$0xff]  }
  0x17   :  { %v444_v25 = vld [vmem:[#allocation3 + $0x60] ss:$12 sps:$4 sm:$0xff]   ;;  %v445_v26 = vld [vmem:[#allocation3 + $0x68] ss:$12 sps:$4 sm:$0xff]   ;;  %v448_v28 = vld [vmem:[#allocation3 + $0x78] ss:$12 sps:$4 sm:$0xff]  }
  0x18   :  { %403 = vmatpush3.bf16.msra.mxu1 %v433_v17  ;;  %v446_v27 = vld [vmem:[#allocation3 + $0x7c] ss:$12 sps:$4 sm:$0xff]   ;;  %v449_v29 = vld [vmem:[#allocation3 + $0x80] ss:$12 sps:$4 sm:$0xff]   ;;  %v490_v31 = vmov 0   ;;  %vm491_vm0 = vmmov 0  }
  0x19   :  { %42 = vadd.xlane.f32.xlu0 %v390_v2  ;;  %245 = vmatpush1.bf16.msra.mxu0 %v432_v16  ;;  %v450_v30 = vld [vmem:[#allocation3 + $0x94] ss:$12 sps:$4 sm:$0xff]   ;;  %v452_v32 = vld [vmem:[#allocation3 + $0x90] ss:$12 sps:$4 sm:$0xff]   ;;  %v453_v33 = vld [vmem:[#allocation3 + $0x98] ss:$12 sps:$4 sm:$0xff]  }
  0x1a   :  { %404 = vmatprep.subr.bf16.mxu1 %v489_v5  ;;  %246 = vmatprep.subr.bf16.mxu0 %v434_v18  ;;  %v454_v34 = vld [vmem:[#allocation3 + $0xac] ss:$12 sps:$4 sm:$0xff]   ;;  %v456_v35 = vld [vmem:[#allocation3 + $0xa8] ss:$12 sps:$4 sm:$0xff]   ;;  %v457_v36 = vld [vmem:[#allocation3 + $0xb0] ss:$12 sps:$4 sm:$0xff]  }
  0x1b   :  { %274 = vmatprep.mubr.bf16.mxu0 %v490_v31  ;;  %416 = vmatprep.mubr.msk.bf16.mxu1 %vm491_vm0, %v489_v5  ;;  %v66_v44 = vshrl.u32 %v65_v41, 7  ;;  %v63_v45 = vld [vmem:[%s570_s1] sm:$0x1] }
  0x1c   :  { %405 = vmatpush3.bf16.msra.mxu1 %v437_v20  ;;  %v64_v46 = vunpack.c.l.bf16 %v63_v45  ;;  %v71_v48 = vld [vmem:[%s571_s2] sm:$0x1] }
  0x1d   :  { %247 = vmatpush1.bf16.msra.mxu0 %v436_v19  ;;  %406 = vmatprep.subr.bf16.mxu1 %v489_v5  ;;  %v67_v47 = vsub.s32 0, %v66_v44  ;;  %v72_v52 = vunpack.c.l.bf16 %v71_v48 }
  0x1e   :  { %248 = vmatprep.subr.bf16.mxu0 %v438_v21 }
  0x1f   :  { %v68_v51 = vrot.slane %v64_v46, %v67_v47  ;;  %v76_v56 = vrot.slane %v72_v52, %v67_v47 }
  0x20   :  { %407 = vmatpush3.bf16.msra.mxu1 %v441_v23 }
  0x21   :  { %249 = vmatpush1.bf16.msra.mxu0 %v440_v22  ;;  %408 = vmatprep.subr.bf16.mxu1 %v489_v5 }
  0x22   :  { %250 = vmatprep.subr.bf16.mxu0 %v442_v24 }
  0x24   :  { %409 = vmatpush3.bf16.msra.mxu1 %v445_v26 }
  0x25   :  { %251 = vmatpush1.bf16.msra.mxu0 %v444_v25  ;;  %410 = vmatprep.subr.bf16.mxu1 %v489_v5 }
  0x26   :  { %252 = vmatprep.subr.bf16.mxu0 %v446_v27 }
  0x28   :  { %411 = vmatpush3.bf16.msra.mxu1 %v449_v29 }
  0x29   :  { %253 = vmatpush1.bf16.msra.mxu0 %v448_v28  ;;  %412 = vmatprep.subr.bf16.mxu1 %v489_v5 }
  0x2a   :  { %254 = vmatprep.subr.bf16.mxu0 %v450_v30 }
  0x2c   :  { %413 = vmatpush3.bf16.msra.mxu1 %v453_v33 }
  0x2d   :  { %255 = vmatpush1.bf16.msra.mxu0 %v452_v32  ;;  %414 = vmatprep.subr.bf16.mxu1 %v489_v5 }
  0x2e   :  { %256 = vmatprep.subr.bf16.mxu0 %v454_v34 }
  0x30   :  { %415 = vmatpush3.bf16.msra.mxu1 %v457_v36 }
  0x31   :  { %257 = vmatpush1.bf16.msra.mxu0 %v456_v35 }
  0xa2   :  { %v41_v8 = vpop.xlane.xlu0 %40 }
  0xa3   :  { %v45_v9 = vmul.f32 0.0078125, %v41_v8 }
  0xa5   :  { %v534_v10 = vsub.f32 %v389_v1, %v45_v9 }
  0xa6   :  { %v43_v11 = vpop.xlane.xlu0 %42 }
  0xa7   :  { %v46_v12 = vmul.f32 0.0078125, %v43_v11  ;;  %v49_v13 = vmul.f32 %v534_v10, %v534_v10 }
  0xa9   :  { %v538_v14 = vsub.f32 %v390_v2, %v46_v12  ;;  %51 = vadd.xlane.f32.xlu1 %v49_v13 }
  0xab   :  { %v50_v15 = vmul.f32 %v538_v14, %v538_v14 }
  0xad   :  { %53 = vadd.xlane.f32.xlu1 %v50_v15 }
 0x136   :  { %v52_v37 = vpop.xlane.xlu1 %51 }
 0x137   :  { %v55_v38 = vmul.f32 0.0078125, %v52_v37 }
 0x139   :  { %v57_v39 = vadd.f32 1e-05, %v55_v38 }
 0x13a   :  { %v54_v40 = vpop.xlane.xlu1 %53 }
 0x13b   :  { %458 = vrsqrt.f32 %v57_v39  ;;  %v56_v42 = vmul.f32 0.0078125, %v54_v40 }
 0x13d   :  { %v58_v43 = vadd.f32 1e-05, %v56_v42 }
 0x13f   :  { %460 = vrsqrt.f32 %v58_v43 }
 0x145   :  { %v459_v49 = vpop.eup %458 }
 0x146   :  { %v61_v50 = vmul.f32 %v459_v49, %v534_v10 }
 0x148   :  { %v69_v55 = vmul.f32 %v68_v51, %v61_v50 }
 0x149   :  { %v461_v53 = vpop.eup %460 }
 0x14a   :  { %v62_v54 = vmul.f32 %v461_v53, %v538_v14  ;;  %v77_v58 = vadd.f32 %v76_v56, %v69_v55 }
 0x14c   :  { %v70_v57 = vmul.f32 %v68_v51, %v62_v54 }
 0x14e   :  { %v78_v59 = vadd.f32 %v76_v56, %v70_v57 }
 0x150   :  { %v79_v60 = vpack.c.bf16 %v78_v59, %v77_v58 }
 0x152   :  { %275 = vmatmul.mubr.bf16.vlgmr.msra.gmra.mrb[0].mxu0 %v79_v60  ;;  %417 = vmatmul.mubr.bf16.vlgmr.msra.gmra.mrb[0].mxu1 %v79_v60 }
 0x225   :  { %v276_v61 = vpop.f32.mrb[0].mxu0  ;;  %v319_v62 = vpop.f32.mrb[0].mxu1 }
 0x226   :  { %v384_v63 = vpack.c.bf16 %v319_v62, %v319_v62  ;;  %v278_v0 = vpop.f32.mrb[1].mxu0  ;;  %v418_v1 = vpop.f32.mrb[1].mxu1 }
 0x227   :  { %v383_v2 = vpack.c.bf16 %v278_v0, %v276_v61  ;;  %v280_v3 = vpop.f32.mrb[2].mxu0  ;;  %v322_v4 = vpop.f32.mrb[2].mxu1 }
 0x228   :  { %347 = vst [vmem:[%s573_s4 + $0x8] sm:$0xf] %v384_v63  ;;  %v386_v5 = vpack.c.bf16 %v322_v4, %v322_v4  ;;  %v282_v6 = vpop.f32.mrb[3].mxu0  ;;  %v419_v7 = vpop.f32.mrb[3].mxu1 }
 0x229   :  { %346 = vst [vmem:[%s573_s4] sm:$0xff] %v383_v2  ;;  %v385_v8 = vpack.c.bf16 %v282_v6, %v280_v3 }
 0x22a   :  { %349 = vst [vmem:[%s573_s4 + $0x14] sm:$0xf] %v386_v5 }
 0x22b   :  { %348 = vst [vmem:[%s573_s4 + $0xc] sm:$0xff] %v385_v8 }
 0x22c   :  { %354 = vsyncpa [#allocation4], 1 }

// kernel: transformer_decoder_block.9
= control target key start
LH: loop header
LB: loop body
LE: loop exit
PB: predicated region body
PF: predicated region fallthrough
CT: control target
= control target key end

     0   :  { %s1046_s12 = smov 0   ;;  %s1048_s13 = smov 0   ;;  %s1175_s0 = inlined_call_operand.vmem [shape: bf16[2,8,384], index: 0, kind: input, shape index: {}, may-alias: {0,1,2}]   ;;  %s1176_s1 = inlined_call_operand.vmem [shape: bf16[2,8,384], index: 1, kind: input, shape index: {}, may-alias: {0,1,2}]   ;;  %s1177_s2 = inlined_call_operand.vmem [shape: bf16[2,8,384], index: 2, kind: input, shape index: {}, may-alias: {0,1,2}]   ;;  %s1178_s3 = inlined_call_operand.vmem [shape: bf16[2,8,128], index: 3, kind: output, shape index: {}]  }
   0x1   :  { %s1050_s14 = smov 0  }
   0x2 LB: > { %s25_s15 = sadd.s32 1, %s1015_s13  ;;  %p858_p0 = scmp.ge.s32.totalorder %s1019_s14, 1  ;;  %s1019_s14 = sphi %s1050_s14, %s13_s14   ;;  %s1015_s13 = sphi %s1048_s13, %s1180_s13   ;;  %s1011_s12 = sphi %s1046_s12, %s1179_s12  }
   0x3   : > { %p27_p1 = scmp.ge.s32.totalorder %s25_s15, 2  ;;  %p179_p2 = scmp.lt.s32.totalorder %s1019_s14, 3 }
   0x5   : > { %s1182_s15 = smov (%p27_p1, %s25_s15), 0  ;;  %p180_p3 = pnand %p858_p0, %p179_p2 }
   0x6   : > { %p221_p4 = scmp.lt.s32.totalorder (!%p180_p3), %s1011_s12, 1  ;;  %v1021_v0 = vmov (!%p180_p3), 0.0   ;;  %vm1022_vm0 = vmmov (!%p180_p3), 0   ;;  %vm262_vm1 = vcmask (!%p180_p3), 261120   ;;  %s1023_s23 = smov (!%p180_p3), 96   ;;  %v253_v6 = vlaneseq (!%p180_p3) }
   0x7   : > { %183 = sbr.rel (%p180_p3) target bundleno = 1168 (0x490), region = 32  ;;  %900 = vmatprep.subr.bf16.mxu0 (!%p180_p3), %v1021_v0  ;;  %902 = vmatprep.mubr.msk.bf16.mxu0 (!%p180_p3), %vm1022_vm0, %v1021_v0  ;;  %s1024_s24 = smov (!%p180_p3), 64   ;;  %vm309_vm3 = vcmask (!%p180_p3), 64512   ;;  %vm323_vm4 = vcmask (!%p180_p3), 1043456   ;;  %vm370_vm5 = vcmask (!%p180_p3), 257024   ;;  %vm498_vm6 = vcmask (!%p180_p3), 519424  }
   0x8   : > { %906 = vmatprep.subr.bf16.mxu1 (!%p180_p3), %v1021_v0  ;;  %908 = vmatprep.mubr.msk.bf16.mxu1 (!%p180_p3), %vm1022_vm0, %v1021_v0  ;;  %s1025_s25 = smov (!%p180_p3), 32   ;;  %v254_v7 = vshrl.u32 (!%p180_p3), %v253_v6, 7  ;;  %v259_v8 = vand.u32 (!%p180_p3), 127, %v253_v6  ;;  %vm617_vm7 = vcmask (!%p180_p3), 781824   ;;  %vm736_vm8 = vcmask (!%p180_p3), 1044224  }
   0xa   : > { %vm260_vm2 = vcmp.gt.s32.totalorder (!%p180_p3), %v259_v8, %v254_v7 }
   0xb   : > { %v1094_v9 = vsel (!%p180_p3), %vm260_vm2, -inf, %v1021_v0 }
   0xe   : > { %s1184_s12 = smov (!%p221_p4, %s1011_s12), 1 }
   0xf   : > { %s1073_s16 = smul.u32 12, %s1184_s12  ;;  %s862_s29 = sshll.u32 %s1184_s12, 2 }
  0x10   : > { %s1157_s5 = scalar_lea.vmem %s1178_s3, %s862_s29 }
  0x11   : > { %s799_s19 = scalar_lea.vmem %s1176_s1, %s1073_s16  ;;  %s229_s22 = scalar_lea.vmem %s1175_s0, %s1073_s16 }
  0x12   : > { %v863_v1 = vld [vmem:[%s799_s19 + $0x4] sm:$0xf]  ;;  %v250_v3 = vld [vmem:[%s229_s22] sm:$0xf]  ;;  %s803_s28 = scalar_lea.vmem %s1177_s2, %s1073_s16 }
  0x13   : > { %v267_v2 = vsel %vm262_vm1, %v863_v1, 0  ;;  %v867_v4 = vcombine.low %v250_v3, %v250_v3  ;;  %v868_v5 = vcombine.low %v863_v1, %v863_v1  ;;  %v864_v16 = vld [vmem:[%s803_s28 + $0x8] sm:$0xf] }
  0x14   : > { %901 = vmatpush3.bf16.xpose.msra.mxu0 %v267_v2  ;;  %v325_v17 = vsel %vm323_vm4, %v864_v16, 0  ;;  %v870_v49 = vcombine.low %v864_v16, %v864_v16 }
  0x15   : > { %918 = vmatprep.subr.bf16.mxu0 %v1021_v0  ;;  %375 = vrot.lane.b32.xlu1 %v867_v4, %s1023_s23 }
  0x16   : > { %907 = vmatpush3.bf16.msra.mxu1 %v325_v17 }
  0x17   : > { %912 = vmatprep.subr.bf16.mxu1 %v1021_v0 }
  0x19   : > { %502 = vrot.lane.b32.xlu1 %v868_v5, %s1024_s24 }
  0x1b   : > { %903 = vmatmul.mubr.msk.bf16.vlgmr.msra.gmra.mrb[0].mxu0 %vm262_vm1, %v250_v3 }
  0x1c   : > { %920 = vmatprep.mubr.msk.bf16.mxu0 %vm1022_vm0, %v1021_v0 }
  0x1d   : > { %500 = vrot.lane.b32.xlu1 %v867_v4, %s1024_s24 }
  0x21   : > { %621 = vrot.lane.b32.xlu1 %v868_v5, %s1025_s25 }
  0x25   : > { %619 = vrot.lane.b32.xlu1 %v867_v4, %s1025_s25 }
  0x87   : > { %v376_v23 = vpop.permute.xlu1 %375 }
  0x8b   : > { %v503_v26 = vpop.permute.xlu1 %502 }
  0x8c   : > { %v508_v27 = vsel %vm262_vm1, %v503_v26, 0 }
  0x8f   : > { %v501_v28 = vpop.permute.xlu1 %500 }
  0x93   : > { %v622_v29 = vpop.permute.xlu1 %621 }
  0x94   : > { %v627_v30 = vsel %vm262_vm1, %v622_v29, 0 }
  0x97   : > { %v620_v31 = vpop.permute.xlu1 %619 }
  0xee   : > { %v303_v10 = vpop.f32.mrb[0].mxu0 }
  0xef   : > { %v304_v11 = vadd.f32 %v303_v10, %v1094_v9  ;;  %v904_v12 = vpop.f32.mrb[1].mxu0 }
  0xf0   : > { %v306_v13 = vpop.f32.mrb[2].mxu0 }
  0xf1   : > { %v905_v14 = vpop.f32.mrb[3].mxu0  ;;  %v310_v15 = vsel %vm309_vm3, %v304_v11, -inf }
  0xf2   : > { %311 = vmax.xlane.f32.xlu0 %v310_v15 }
 0x108   : > { %380 = vrot.lane.b32.xlu0 %v868_v5, %s1023_s23 }
 0x17f   : > { %v312_v18 = vpop.xlane.xlu0 %311 }
 0x180   : > { %v313_v19 = vsub.f32 %v304_v11, %v312_v18 }
 0x182   : > { %v314_v20 = vmul.f32 1.442695, %v313_v19 }
 0x183   : > { %v381_v21 = vpop.permute.xlu0 %380 }
 0x184   : > { %981 = vpow2.f32 %v314_v20  ;;  %v386_v24 = vsel %vm262_vm1, %v381_v21, 0 }
 0x18e   : > { %v1105_v22 = vpop.eup %981 }
 0x18f   : > { %v319_v25 = vpack.c.bf16 %v1105_v22, %v1105_v22  ;;  %v316_v16 = vsel %vm309_vm3, %v1105_v22, 0.0 }
 0x191   : > { %909 = vmatmul.mubr.msk.bf16.vlgmr.msra.gmra.mrb[0].mxu1 %vm309_vm3, %v319_v25 }
 0x192   : > { %913 = vmatpush3.bf16.xpose.msra.mxu1 %v386_v24  ;;  %914 = vmatprep.mubr.msk.bf16.mxu1 %vm1022_vm0, %v1021_v0 }
 0x193   : > { %924 = vmatprep.subr.bf16.mxu1 %v1021_v0 }
 0x199   : > { %915 = vmatmul.mubr.msk.bf16.vlgmr.msra.gmra.mrb[4].mxu1 %vm262_vm1, %v376_v23 }
 0x19a   : > { %925 = vmatpush3.bf16.xpose.msra.mxu1 %v508_v27  ;;  %926 = vmatprep.mubr.msk.bf16.mxu1 %vm1022_vm0, %v1021_v0 }
 0x19b   : > { %936 = vmatprep.subr.bf16.mxu1 %v1021_v0 }
 0x1a1   : > { %927 = vmatmul.mubr.msk.bf16.vlgmr.msra.gmra.mrb[8].mxu1 %vm262_vm1, %v501_v28 }
 0x1a2   : > { %937 = vmatpush3.bf16.xpose.msra.mxu1 %v627_v30  ;;  %938 = vmatprep.mubr.msk.bf16.mxu1 %vm1022_vm0, %v1021_v0 }
 0x1a9   : > { %939 = vmatmul.mubr.msk.bf16.vlgmr.msra.gmra.mrb[12].mxu1 %vm262_vm1, %v620_v31 }
 0x264   : > { %v1124_v32 = vpop.f32.mrb[0].mxu1 }
 0x265   : > { %v910_v33 = vpop.f32.mrb[1].mxu1 }
 0x266   : > { %v364_v34 = vpop.f32.mrb[2].mxu1 }
 0x267   : > { %v911_v35 = vpop.f32.mrb[3].mxu1 }
 0x26c   : > { %v422_v36 = vpop.f32.mrb[4].mxu1 }
 0x26d   : > { %v423_v37 = vadd.f32 %v422_v36, %v1094_v9  ;;  %v916_v38 = vpop.f32.mrb[5].mxu1 }
 0x26e   : > { %v425_v39 = vpop.f32.mrb[6].mxu1 }
 0x26f   : > { %v917_v40 = vpop.f32.mrb[7].mxu1  ;;  %v428_v41 = vsel %vm309_vm3, %v423_v37, -inf }
 0x270   : > { %429 = vmax.xlane.f32.xlu1 %v428_v41 }
 0x274   : > { %v544_v42 = vpop.f32.mrb[8].mxu1 }
 0x275   : > { %v545_v43 = vadd.f32 %v544_v42, %v1094_v9  ;;  %v928_v44 = vpop.f32.mrb[9].mxu1 }
 0x276   : > { %v547_v45 = vpop.f32.mrb[10].mxu1 }
 0x277   : > { %v550_v46 = vsel %vm309_vm3, %v545_v43, -inf  ;;  %v929_v47 = vpop.f32.mrb[11].mxu1 }
 0x278   : > { %551 = vmax.xlane.f32.xlu0 %v550_v46 }
 0x27c   : > { %v663_v48 = vpop.f32.mrb[12].mxu1 }
 0x27d   : > { %v940_v50 = vpop.f32.mrb[13].mxu1  ;;  %v664_v53 = vadd.f32 %v663_v48, %v1094_v9 }
 0x27e   : > { %v666_v51 = vpop.f32.mrb[14].mxu1 }
 0x27f   : > { %v941_v52 = vpop.f32.mrb[15].mxu1  ;;  %v669_v54 = vsel %vm309_vm3, %v664_v53, -inf }
 0x281   : > { %560 = vrot.lane.b32.xlu1 %v870_v49, %s1024_s24 }
 0x28e   : > { %441 = vrot.lane.b32.xlu0 %v870_v49, %s1023_s23 }
 0x2a5   : > { %670 = vmax.xlane.f32.xlu1 %v669_v54 }
 0x2b6   : > { %679 = vrot.lane.b32.xlu1 %v870_v49, %s1025_s25 }
 0x2fd   : > { %v430_v55 = vpop.xlane.xlu1 %429 }
 0x2fe   : > { %v431_v56 = vsub.f32 %v423_v37, %v430_v55 }
 0x300   : > { %v432_v57 = vmul.f32 1.442695, %v431_v56 }
 0x301   : > { %v561_v1 = vpop.permute.xlu1 %560 }
 0x302   : > { %983 = vpow2.f32 %v432_v57  ;;  %v566_v4 = vsel %vm323_vm4, %v561_v1, 0 }
 0x305   : > { %v552_v58 = vpop.xlane.xlu0 %551 }
 0x306   : > { %v553_v59 = vsub.f32 %v545_v43, %v552_v58 }
 0x308   : > { %v554_v60 = vmul.f32 1.442695, %v553_v59 }
 0x309   : > { %v442_v61 = vpop.permute.xlu0 %441 }
 0x30a   : > { %985 = vpow2.f32 %v554_v60  ;;  %v447_v62 = vsel %vm323_vm4, %v442_v61, 0 }
 0x30b   : > { %919 = vmatpush3.bf16.msra.mxu0 %v447_v62 }
 0x30c   : > { %v984_v63 = vpop.eup %983  ;;  %930 = vmatprep.subr.bf16.mxu0 %v1021_v0 }
 0x30d   : > { %v434_v2 = vsel %vm309_vm3, %v984_v63, 0.0  ;;  %v437_v3 = vpack.c.bf16 %v984_v63, %v984_v63 }
 0x30e   : > { %435 = vadd.xlane.f32.xlu0 %v434_v2 }
 0x30f   : > { %921 = vmatmul.mubr.msk.bf16.vlgmr.msra.gmra.mrb[4].mxu0 %vm309_vm3, %v437_v3 }
 0x310   : > { %931 = vmatpush3.bf16.msra.mxu0 %v566_v4  ;;  %932 = vmatprep.mubr.msk.bf16.mxu0 %vm1022_vm0, %v1021_v0 }
 0x311   : > { %942 = vmatprep.subr.bf16.mxu0 %v1021_v0 }
 0x314   : > { %v986_v5 = vpop.eup %985 }
 0x315   : > { %v556_v6 = vsel %vm309_vm3, %v986_v5, 0.0  ;;  %v559_v7 = vpack.c.bf16 %v986_v5, %v986_v5 }
 0x316   : > { %557 = vadd.xlane.f32.xlu1 %v556_v6 }
 0x317   : > { %933 = vmatmul.mubr.msk.bf16.vlgmr.msra.gmra.mrb[8].mxu0 %vm309_vm3, %v559_v7 }
 0x318   : > { %944 = vmatprep.mubr.msk.bf16.mxu0 %vm1022_vm0, %v1021_v0 }
 0x332   : > { %v671_v8 = vpop.xlane.xlu1 %670 }
 0x333   : > { %v672_v9 = vsub.f32 %v664_v53, %v671_v8 }
 0x335   : > { %v673_v10 = vmul.f32 1.442695, %v672_v9 }
 0x336   : > { %v680_v11 = vpop.permute.xlu1 %679 }
 0x337   : > { %987 = vpow2.f32 %v673_v10  ;;  %v685_v12 = vsel %vm323_vm4, %v680_v11, 0 }
 0x338   : > { %943 = vmatpush3.bf16.msra.mxu0 %v685_v12 }
 0x341   : > { %v988_v13 = vpop.eup %987 }
 0x342   : > { %v675_v14 = vsel %vm309_vm3, %v988_v13, 0.0  ;;  %v678_v15 = vpack.c.bf16 %v988_v13, %v988_v13 }
 0x343   : > { %676 = vadd.xlane.f32.xlu0 %v675_v14 }
 0x344   : > { %945 = vmatmul.mubr.msk.bf16.vlgmr.msra.gmra.mrb[12].mxu0 %vm309_vm3, %v678_v15 }
 0x347   : > { %317 = vadd.xlane.f32.xlu0 %v316_v16 }
 0x39b   : > { %v436_v0 = vpop.xlane.xlu0 %435 }
 0x3a3   : > { %v558_v19 = vpop.xlane.xlu1 %557 }
 0x3d0   : > { %v677_v17 = vpop.xlane.xlu0 %676 }
 0x3d4   : > { %v318_v18 = vpop.xlane.xlu0 %317 }
 0x3d5   : > { %989 = vrcp.f32 %v318_v18 }
 0x3d6   : > { %991 = vrcp.f32 %v436_v0 }
 0x3d7   : > { %993 = vrcp.f32 %v558_v19 }
 0x3d8   : > { %995 = vrcp.f32 %v677_v17 }
 0x3df   : > { %v990_v20 = vpop.eup %989 }
 0x3e0   : > { %v368_v21 = vmul.f32 %v990_v20, %v1124_v32  ;;  %v992_v22 = vpop.eup %991 }
 0x3e1   : > { %v994_v30 = vpop.eup %993 }
 0x3e2   : > { %v483_v23 = vpop.f32.mrb[4].mxu0  ;;  %v369_v24 = vpack.c.bf16 %v368_v21, %v368_v21  ;;  %v996_v37 = vpop.eup %995 }
 0x3e3   : > { %v490_v25 = vmul.f32 %v992_v22, %v483_v23  ;;  %v922_v26 = vpop.f32.mrb[5].mxu0 }
 0x3e4   : > { %v486_v27 = vpop.f32.mrb[6].mxu0  ;;  %371 = vst.msk [vmem:[%s1157_s5] sm:$0xf] %vm370_vm5, %v369_v24 }
 0x3e5   : > { %v881_v28 = vpack.c.bf16 %v490_v25, %v490_v25  ;;  %v923_v29 = vpop.f32.mrb[7].mxu0 }
 0x3e7   : > { %495 = vrot.lane.b32.xlu1 %v881_v28, %s1025_s25 }
 0x3ea   : > { %v602_v31 = vpop.f32.mrb[8].mxu0 }
 0x3eb   : > { %v609_v32 = vmul.f32 %v994_v30, %v602_v31  ;;  %v934_v33 = vpop.f32.mrb[9].mxu0 }
 0x3ec   : > { %v605_v34 = vpop.f32.mrb[10].mxu0 }
 0x3ed   : > { %v882_v35 = vpack.c.bf16 %v609_v32, %v609_v32  ;;  %v935_v36 = vpop.f32.mrb[11].mxu0 }
 0x3ef   : > { %614 = vrot.lane.b32.xlu0 %v882_v35, %s1024_s24 }
 0x417   : > { %v721_v38 = vpop.f32.mrb[12].mxu0 }
 0x418   : > { %v728_v39 = vmul.f32 %v996_v37, %v721_v38  ;;  %v946_v40 = vpop.f32.mrb[13].mxu0 }
 0x419   : > { %v724_v41 = vpop.f32.mrb[14].mxu0 }
 0x41a   : > { %v883_v42 = vpack.c.bf16 %v728_v39, %v728_v39  ;;  %v947_v43 = vpop.f32.mrb[15].mxu0 }
 0x41c   : > { %733 = vrot.lane.b32.xlu1 %v883_v42, %s1023_s23 }
 0x459   : > { %v496_v44 = vpop.permute.xlu1 %495 }
 0x45a   : > { %499 = vst.msk [vmem:[%s1157_s5] sm:$0xf] %vm498_vm6, %v496_v44 }
 0x461   : > { %v615_v45 = vpop.permute.xlu0 %614 }
 0x462   : > { %618 = vst.msk [vmem:[%s1157_s5] sm:$0xf] %vm617_vm7, %v615_v45 }
 0x48e   : > { %v734_v46 = vpop.permute.xlu1 %733 }
 0x48f   : > { %737 = vst.msk [vmem:[%s1157_s5] sm:$0xf] %vm736_vm8, %v734_v46 }
 0x490 PF: > { %s13_s14 = sadd.s32 1, %s1019_s14   ;;  %s1179_s12 = smov %s1015_s13 }
 0x491   : > { %p10_p5 = scmp.ge.s32.totalorder %s13_s14, 4   ;;  %s1180_s13 = smov %s1182_s15 }
 0x493   :  { %12 = sbr.rel (!%p10_p5) target bundleno = 2 (0x2), region = 68 }

// kernel: transformer_decoder_block.12
= control target key start
LH: loop header
LB: loop body
LE: loop exit
PB: predicated region body
PF: predicated region fallthrough
CT: control target
= control target key end

     0   :  { %v251_v1 = vmov 0   ;;  %s324_s1 = inlined_call_operand.vmem [shape: bf16[128,256], index: 1, kind: input, shape index: {}]   ;;  %s325_s0 = inlined_call_operand.vmem [shape: bf16[16,128], index: 0, kind: input, shape index: {}]   ;;  %s326_s2 = inlined_call_operand.vmem [shape: bf16[16,256], index: 2, kind: output, shape index: {}]  }
   0x1   :  { %v226_v0 = vld [vmem:[%s324_s1 + $0x4] ss:$8 sps:$4 sm:$0xff]   ;;  %160 = vmatprep.mubr.bf16.mxu0 %v251_v1  ;;  %v228_v2 = vld [vmem:[%s324_s1] ss:$8 sps:$4 sm:$0xff]   ;;  %v229_v3 = vld [vmem:[%s324_s1 + $0x14] ss:$8 sps:$4 sm:$0xff]  }
   0x2   :  { %128 = vmatprep.subr.bf16.mxu0 %v226_v0  ;;  %v231_v4 = vld [vmem:[%s324_s1 + $0x10] ss:$8 sps:$4 sm:$0xff]   ;;  %v232_v5 = vld [vmem:[%s324_s1 + $0x24] ss:$8 sps:$4 sm:$0xff]   ;;  %v234_v6 = vld [vmem:[%s324_s1 + $0x20] ss:$8 sps:$4 sm:$0xff]  }
   0x3   :  { %129 = vmatpush1.bf16.msra.mxu0 %v228_v2  ;;  %v235_v7 = vld [vmem:[%s324_s1 + $0x34] ss:$8 sps:$4 sm:$0xff]   ;;  %v237_v8 = vld [vmem:[%s324_s1 + $0x30] ss:$8 sps:$4 sm:$0xff]   ;;  %v238_v9 = vld [vmem:[%s324_s1 + $0x44] ss:$8 sps:$4 sm:$0xff]  }
   0x4   :  { %130 = vmatprep.subr.bf16.mxu0 %v229_v3  ;;  %v240_v10 = vld [vmem:[%s324_s1 + $0x40] ss:$8 sps:$4 sm:$0xff]   ;;  %v241_v11 = vld [vmem:[%s324_s1 + $0x54] ss:$8 sps:$4 sm:$0xff]   ;;  %v243_v12 = vld [vmem:[%s324_s1 + $0x50] ss:$8 sps:$4 sm:$0xff]  }
   0x5   :  { %v244_v13 = vld [vmem:[%s324_s1 + $0x64] ss:$8 sps:$4 sm:$0xff]   ;;  %v246_v14 = vld [vmem:[%s324_s1 + $0x60] ss:$8 sps:$4 sm:$0xff]   ;;  %v247_v15 = vld [vmem:[%s324_s1 + $0x74] ss:$8 sps:$4 sm:$0xff]  }
   0x6   :  { %v249_v16 = vld [vmem:[%s324_s1 + $0x70] ss:$8 sps:$4 sm:$0xff]   ;;  %v250_v17 = vld [vmem:[%s325_s0] sm:$0xff]  }
   0x7   :  { %131 = vmatpush1.bf16.msra.mxu0 %v231_v4 }
   0x8   :  { %132 = vmatprep.subr.bf16.mxu0 %v232_v5 }
   0xb   :  { %133 = vmatpush1.bf16.msra.mxu0 %v234_v6 }
   0xc   :  { %134 = vmatprep.subr.bf16.mxu0 %v235_v7 }
   0xf   :  { %135 = vmatpush1.bf16.msra.mxu0 %v237_v8 }
  0x10   :  { %136 = vmatprep.subr.bf16.mxu0 %v238_v9 }
  0x13   :  { %137 = vmatpush1.bf16.msra.mxu0 %v240_v10 }
  0x14   :  { %138 = vmatprep.subr.bf16.mxu0 %v241_v11 }
  0x17   :  { %139 = vmatpush1.bf16.msra.mxu0 %v243_v12 }
  0x18   :  { %140 = vmatprep.subr.bf16.mxu0 %v244_v13 }
  0x1b   :  { %141 = vmatpush1.bf16.msra.mxu0 %v246_v14 }
  0x1c   :  { %142 = vmatprep.subr.bf16.mxu0 %v247_v15 }
  0x1f   :  { %143 = vmatpush1.bf16.msra.mxu0 %v249_v16 }
  0x22   :  { %161 = vmatmul.mubr.bf16.vlgmr.msra.gmra.mrb[0].mxu0 %v250_v17 }
  0xf5   :  { %v162_v18 = vpop.f32.mrb[0].mxu0 }
  0xf6   :  { %v164_v19 = vpop.f32.mrb[1].mxu0 }
  0xf7   :  { %v223_v20 = vpack.c.bf16 %v164_v19, %v162_v18  ;;  %v166_v21 = vpop.f32.mrb[2].mxu0 }
  0xf8   :  { %v168_v22 = vpop.f32.mrb[3].mxu0 }
  0xf9   :  { %198 = vst [vmem:[%s326_s2] sm:$0xff] %v223_v20  ;;  %v224_v23 = vpack.c.bf16 %v168_v22, %v166_v21 }
  0xfb   :  { %199 = vst [vmem:[%s326_s2 + $0x8] sm:$0xff] %v224_v23 }

// kernel: transformer_decoder_block.13
= control target key start
LH: loop header
LB: loop body
LE: loop exit
PB: predicated region body
PF: predicated region fallthrough
CT: control target
= control target key end

     0   :  { %s1018_s12 = smov 0   ;;  %s1020_s13 = smov 0   ;;  %s1143_s0 = inlined_call_operand.vmem [shape: bf16[2,8,128], index: 0, kind: input, shape index: {}]   ;;  %s1144_s1 = inlined_call_operand.vmem [shape: bf16[2,8,256], index: 1, kind: input, shape index: {}, may-alias: {1,2}]   ;;  %s1145_s2 = inlined_call_operand.vmem [shape: bf16[2,8,256], index: 2, kind: input, shape index: {}, may-alias: {1,2}]   ;;  %s1146_s3 = inlined_call_operand.vmem [shape: bf16[2,8,128], index: 3, kind: output, shape index: {}]  }
   0x1   :  { %s1022_s14 = smov 0  }
   0x2 LB: > { %s25_s15 = sadd.s32 1, %s987_s13  ;;  %p828_p0 = scmp.ge.s32.totalorder %s991_s14, 1  ;;  %s991_s14 = sphi %s1022_s14, %s13_s14   ;;  %s987_s13 = sphi %s1020_s13, %s1148_s13   ;;  %s983_s12 = sphi %s1018_s12, %s1147_s12  }
   0x3   : > { %p27_p1 = scmp.ge.s32.totalorder %s25_s15, 2  ;;  %p176_p2 = scmp.lt.s32.totalorder %s991_s14, 3 }
   0x5   : > { %s1150_s15 = smov (%p27_p1, %s25_s15), 0  ;;  %p177_p3 = pnand %p828_p0, %p176_p2 }
   0x6   : > { %p215_p4 = scmp.lt.s32.totalorder (!%p177_p3), %s983_s12, 1  ;;  %v993_v0 = vmov (!%p177_p3), 0.0   ;;  %vm994_vm0 = vmmov (!%p177_p3), 0   ;;  %vm244_vm1 = vcmask (!%p177_p3), 261120   ;;  %s995_s24 = smov (!%p177_p3), 96   ;;  %vm291_vm2 = vcmask (!%p177_p3), 64512  }
   0x7   : > { %180 = sbr.rel (%p177_p3) target bundleno = 1163 (0x48b), region = 32  ;;  %873 = vmatprep.subr.bf16.mxu0 (!%p177_p3), %v993_v0  ;;  %875 = vmatprep.mubr.msk.bf16.mxu0 (!%p177_p3), %vm994_vm0, %v993_v0  ;;  %s996_s25 = smov (!%p177_p3), 64   ;;  %vm305_vm3 = vcmask (!%p177_p3), 1043456   ;;  %vm352_vm4 = vcmask (!%p177_p3), 257024   ;;  %vm480_vm5 = vcmask (!%p177_p3), 519424   ;;  %vm599_vm6 = vcmask (!%p177_p3), 781824  }
   0x8   : > { %879 = vmatprep.subr.bf16.mxu1 (!%p177_p3), %v993_v0  ;;  %881 = vmatprep.mubr.msk.bf16.mxu1 (!%p177_p3), %vm994_vm0, %v993_v0  ;;  %s997_s26 = smov (!%p177_p3), 32   ;;  %vm718_vm7 = vcmask (!%p177_p3), 1044224  }
   0xe   : > { %s1152_s12 = smov (!%p215_p4, %s983_s12), 1 }
   0xf   : > { %s852_s16 = sshll.u32 %s1152_s12, 3  ;;  %s829_s20 = sshll.u32 %s1152_s12, 2 }
  0x10   : > { %s226_s19 = scalar_lea.vmem %s1144_s1, %s852_s16  ;;  %s221_s23 = scalar_lea.vmem %s1143_s0, %s829_s20 }
  0x11   : > { %v242_v1 = vld [vmem:[%s226_s19] sm:$0xf]  ;;  %s773_s29 = scalar_lea.vmem %s1145_s2, %s852_s16  ;;  %s1125_s5 = scalar_lea.vmem %s1146_s3, %s829_s20 }
  0x12   : > { %v249_v2 = vsel %vm244_vm1, %v242_v1, 0  ;;  %v241_v3 = vld [vmem:[%s221_s23] sm:$0xf]  ;;  %v839_v5 = vcombine.low %v242_v1, %v242_v1  ;;  %v835_v11 = vld [vmem:[%s773_s29 + $0x4] sm:$0xf] }
  0x13   : > { %874 = vmatpush3.bf16.xpose.msra.mxu0 %v249_v2  ;;  %v838_v4 = vcombine.low %v241_v3, %v241_v3  ;;  %v307_v12 = vsel %vm305_vm3, %v835_v11, 0  ;;  %v841_v41 = vcombine.low %v835_v11, %v835_v11 }
  0x14   : > { %891 = vmatprep.subr.bf16.mxu0 %v993_v0  ;;  %880 = vmatpush3.bf16.msra.mxu1 %v307_v12 }
  0x15   : > { %357 = vrot.lane.b32.xlu1 %v838_v4, %s995_s24  ;;  %885 = vmatprep.subr.bf16.mxu1 %v993_v0 }
  0x19   : > { %484 = vrot.lane.b32.xlu1 %v839_v5, %s996_s25 }
  0x1a   : > { %876 = vmatmul.mubr.msk.bf16.vlgmr.msra.gmra.mrb[0].mxu0 %vm244_vm1, %v241_v3 }
  0x1b   : > { %893 = vmatprep.mubr.msk.bf16.mxu0 %vm994_vm0, %v993_v0 }
  0x1d   : > { %482 = vrot.lane.b32.xlu1 %v838_v4, %s996_s25 }
  0x21   : > { %603 = vrot.lane.b32.xlu1 %v839_v5, %s997_s26 }
  0x25   : > { %601 = vrot.lane.b32.xlu1 %v838_v4, %s997_s26 }
  0x87   : > { %v358_v18 = vpop.permute.xlu1 %357 }
  0x8b   : > { %v485_v21 = vpop.permute.xlu1 %484 }
  0x8c   : > { %v490_v22 = vsel %vm244_vm1, %v485_v21, 0 }
  0x8f   : > { %v483_v23 = vpop.permute.xlu1 %482 }
  0x93   : > { %v604_v24 = vpop.permute.xlu1 %603 }
  0x94   : > { %v609_v25 = vsel %vm244_vm1, %v604_v24, 0 }
  0x97   : > { %v602_v26 = vpop.permute.xlu1 %601 }
  0xed   : > { %v285_v6 = vpop.f32.mrb[0].mxu0 }
  0xee   : > { %v877_v7 = vpop.f32.mrb[1].mxu0  ;;  %v292_v8 = vsel %vm291_vm2, %v285_v6, -inf }
  0xef   : > { %293 = vmax.xlane.f32.xlu0 %v292_v8  ;;  %v288_v9 = vpop.f32.mrb[2].mxu0 }
  0xf0   : > { %v878_v10 = vpop.f32.mrb[3].mxu0 }
 0x105   : > { %362 = vrot.lane.b32.xlu0 %v839_v5, %s995_s24 }
 0x17c   : > { %v294_v13 = vpop.xlane.xlu0 %293 }
 0x17d   : > { %v295_v14 = vsub.f32 %v285_v6, %v294_v13 }
 0x17f   : > { %v296_v15 = vmul.f32 1.442695, %v295_v14 }
 0x180   : > { %v363_v16 = vpop.permute.xlu0 %362 }
 0x181   : > { %953 = vpow2.f32 %v296_v15  ;;  %v368_v19 = vsel %vm244_vm1, %v363_v16, 0 }
 0x18b   : > { %v1075_v17 = vpop.eup %953 }
 0x18c   : > { %v301_v20 = vpack.c.bf16 %v1075_v17, %v1075_v17  ;;  %v298_v8 = vsel %vm291_vm2, %v1075_v17, 0.0 }
 0x18e   : > { %882 = vmatmul.mubr.msk.bf16.vlgmr.msra.gmra.mrb[0].mxu1 %vm291_vm2, %v301_v20 }
 0x18f   : > { %886 = vmatpush3.bf16.xpose.msra.mxu1 %v368_v19  ;;  %887 = vmatprep.mubr.msk.bf16.mxu1 %vm994_vm0, %v993_v0 }
 0x190   : > { %897 = vmatprep.subr.bf16.mxu1 %v993_v0 }
 0x196   : > { %888 = vmatmul.mubr.msk.bf16.vlgmr.msra.gmra.mrb[4].mxu1 %vm244_vm1, %v358_v18 }
 0x197   : > { %898 = vmatpush3.bf16.xpose.msra.mxu1 %v490_v22  ;;  %899 = vmatprep.mubr.msk.bf16.mxu1 %vm994_vm0, %v993_v0 }
 0x198   : > { %909 = vmatprep.subr.bf16.mxu1 %v993_v0 }
 0x19e   : > { %900 = vmatmul.mubr.msk.bf16.vlgmr.msra.gmra.mrb[8].mxu1 %vm244_vm1, %v483_v23 }
 0x19f   : > { %910 = vmatpush3.bf16.xpose.msra.mxu1 %v609_v25  ;;  %911 = vmatprep.mubr.msk.bf16.mxu1 %vm994_vm0, %v993_v0 }
 0x1a6   : > { %912 = vmatmul.mubr.msk.bf16.vlgmr.msra.gmra.mrb[12].mxu1 %vm244_vm1, %v602_v26 }
 0x261   : > { %v1094_v27 = vpop.f32.mrb[0].mxu1 }
 0x262   : > { %v883_v28 = vpop.f32.mrb[1].mxu1 }
 0x263   : > { %v346_v29 = vpop.f32.mrb[2].mxu1 }
 0x264   : > { %v884_v30 = vpop.f32.mrb[3].mxu1 }
 0x269   : > { %v404_v31 = vpop.f32.mrb[4].mxu1 }
 0x26a   : > { %v889_v32 = vpop.f32.mrb[5].mxu1  ;;  %v410_v33 = vsel %vm291_vm2, %v404_v31, -inf }
 0x26b   : > { %411 = vmax.xlane.f32.xlu1 %v410_v33  ;;  %v407_v34 = vpop.f32.mrb[6].mxu1 }
 0x26c   : > { %v890_v35 = vpop.f32.mrb[7].mxu1 }
 0x271   : > { %v526_v36 = vpop.f32.mrb[8].mxu1 }
 0x272   : > { %v532_v37 = vsel %vm291_vm2, %v526_v36, -inf  ;;  %v901_v38 = vpop.f32.mrb[9].mxu1 }
 0x273   : > { %533 = vmax.xlane.f32.xlu0 %v532_v37  ;;  %v529_v39 = vpop.f32.mrb[10].mxu1 }
 0x274   : > { %v902_v40 = vpop.f32.mrb[11].mxu1 }
 0x279   : > { %v645_v42 = vpop.f32.mrb[12].mxu1 }
 0x27a   : > { %v913_v43 = vpop.f32.mrb[13].mxu1  ;;  %v651_v46 = vsel %vm291_vm2, %v645_v42, -inf }
 0x27b   : > { %v648_v44 = vpop.f32.mrb[14].mxu1 }
 0x27c   : > { %542 = vrot.lane.b32.xlu1 %v841_v41, %s996_s25  ;;  %v914_v45 = vpop.f32.mrb[15].mxu1 }
 0x289   : > { %423 = vrot.lane.b32.xlu0 %v841_v41, %s995_s24 }
 0x2a0   : > { %652 = vmax.xlane.f32.xlu1 %v651_v46 }
 0x2b1   : > { %661 = vrot.lane.b32.xlu1 %v841_v41, %s997_s26 }
 0x2f8   : > { %v412_v47 = vpop.xlane.xlu1 %411 }
 0x2f9   : > { %v413_v48 = vsub.f32 %v404_v31, %v412_v47 }
 0x2fb   : > { %v414_v49 = vmul.f32 1.442695, %v413_v48 }
 0x2fc   : > { %v543_v56 = vpop.permute.xlu1 %542 }
 0x2fd   : > { %955 = vpow2.f32 %v414_v49  ;;  %v548_v59 = vsel %vm305_vm3, %v543_v56, 0 }
 0x300   : > { %v534_v50 = vpop.xlane.xlu0 %533 }
 0x301   : > { %v535_v51 = vsub.f32 %v526_v36, %v534_v50 }
 0x303   : > { %v536_v52 = vmul.f32 1.442695, %v535_v51 }
 0x304   : > { %v424_v53 = vpop.permute.xlu0 %423 }
 0x305   : > { %957 = vpow2.f32 %v536_v52  ;;  %v429_v54 = vsel %vm305_vm3, %v424_v53, 0 }
 0x306   : > { %892 = vmatpush3.bf16.msra.mxu0 %v429_v54 }
 0x307   : > { %v956_v55 = vpop.eup %955  ;;  %903 = vmatprep.subr.bf16.mxu0 %v993_v0 }
 0x308   : > { %v416_v57 = vsel %vm291_vm2, %v956_v55, 0.0  ;;  %v419_v58 = vpack.c.bf16 %v956_v55, %v956_v55 }
 0x309   : > { %417 = vadd.xlane.f32.xlu0 %v416_v57 }
 0x30a   : > { %894 = vmatmul.mubr.msk.bf16.vlgmr.msra.gmra.mrb[4].mxu0 %vm291_vm2, %v419_v58 }
 0x30b   : > { %904 = vmatpush3.bf16.msra.mxu0 %v548_v59  ;;  %905 = vmatprep.mubr.msk.bf16.mxu0 %vm994_vm0, %v993_v0 }
 0x30c   : > { %915 = vmatprep.subr.bf16.mxu0 %v993_v0 }
 0x30f   : > { %v958_v60 = vpop.eup %957 }
 0x310   : > { %v538_v61 = vsel %vm291_vm2, %v958_v60, 0.0  ;;  %v541_v62 = vpack.c.bf16 %v958_v60, %v958_v60 }
 0x311   : > { %539 = vadd.xlane.f32.xlu1 %v538_v61 }
 0x312   : > { %906 = vmatmul.mubr.msk.bf16.vlgmr.msra.gmra.mrb[8].mxu0 %vm291_vm2, %v541_v62 }
 0x313   : > { %917 = vmatprep.mubr.msk.bf16.mxu0 %vm994_vm0, %v993_v0 }
 0x32d   : > { %v653_v63 = vpop.xlane.xlu1 %652 }
 0x32e   : > { %v654_v1 = vsub.f32 %v645_v42, %v653_v63 }
 0x330   : > { %v655_v2 = vmul.f32 1.442695, %v654_v1 }
 0x331   : > { %v662_v3 = vpop.permute.xlu1 %661 }
 0x332   : > { %959 = vpow2.f32 %v655_v2  ;;  %v667_v4 = vsel %vm305_vm3, %v662_v3, 0 }
 0x333   : > { %916 = vmatpush3.bf16.msra.mxu0 %v667_v4 }
 0x33c   : > { %v960_v5 = vpop.eup %959 }
 0x33d   : > { %v657_v6 = vsel %vm291_vm2, %v960_v5, 0.0  ;;  %v660_v7 = vpack.c.bf16 %v960_v5, %v960_v5 }
 0x33e   : > { %658 = vadd.xlane.f32.xlu0 %v657_v6 }
 0x33f   : > { %918 = vmatmul.mubr.msk.bf16.vlgmr.msra.gmra.mrb[12].mxu0 %vm291_vm2, %v660_v7 }
 0x342   : > { %299 = vadd.xlane.f32.xlu0 %v298_v8 }
 0x396   : > { %v418_v0 = vpop.xlane.xlu0 %417 }
 0x39e   : > { %v540_v11 = vpop.xlane.xlu1 %539 }
 0x3cb   : > { %v659_v9 = vpop.xlane.xlu0 %658 }
 0x3cf   : > { %v300_v10 = vpop.xlane.xlu0 %299 }
 0x3d0   : > { %961 = vrcp.f32 %v300_v10 }
 0x3d1   : > { %963 = vrcp.f32 %v418_v0 }
 0x3d2   : > { %965 = vrcp.f32 %v540_v11 }
 0x3d3   : > { %967 = vrcp.f32 %v659_v9 }
 0x3da   : > { %v962_v12 = vpop.eup %961 }
 0x3db   : > { %v350_v13 = vmul.f32 %v962_v12, %v1094_v27  ;;  %v964_v14 = vpop.eup %963 }
 0x3dc   : > { %v966_v22 = vpop.eup %965 }
 0x3dd   : > { %v465_v15 = vpop.f32.mrb[4].mxu0  ;;  %v351_v16 = vpack.c.bf16 %v350_v13, %v350_v13  ;;  %v968_v29 = vpop.eup %967 }
 0x3de   : > { %v472_v17 = vmul.f32 %v964_v14, %v465_v15  ;;  %v895_v18 = vpop.f32.mrb[5].mxu0 }
 0x3df   : > { %v468_v19 = vpop.f32.mrb[6].mxu0  ;;  %353 = vst.msk [vmem:[%s1125_s5] sm:$0xf] %vm352_vm4, %v351_v16 }
 0x3e0   : > { %v854_v20 = vpack.c.bf16 %v472_v17, %v472_v17  ;;  %v896_v21 = vpop.f32.mrb[7].mxu0 }
 0x3e2   : > { %477 = vrot.lane.b32.xlu1 %v854_v20, %s997_s26 }
 0x3e5   : > { %v584_v23 = vpop.f32.mrb[8].mxu0 }
 0x3e6   : > { %v591_v24 = vmul.f32 %v966_v22, %v584_v23  ;;  %v907_v25 = vpop.f32.mrb[9].mxu0 }
 0x3e7   : > { %v587_v26 = vpop.f32.mrb[10].mxu0 }
 0x3e8   : > { %v855_v27 = vpack.c.bf16 %v591_v24, %v591_v24  ;;  %v908_v28 = vpop.f32.mrb[11].mxu0 }
 0x3ea   : > { %596 = vrot.lane.b32.xlu0 %v855_v27, %s996_s25 }
 0x412   : > { %v703_v30 = vpop.f32.mrb[12].mxu0 }
 0x413   : > { %v710_v31 = vmul.f32 %v968_v29, %v703_v30  ;;  %v919_v32 = vpop.f32.mrb[13].mxu0 }
 0x414   : > { %v706_v33 = vpop.f32.mrb[14].mxu0 }
 0x415   : > { %v856_v34 = vpack.c.bf16 %v710_v31, %v710_v31  ;;  %v920_v35 = vpop.f32.mrb[15].mxu0 }
 0x417   : > { %715 = vrot.lane.b32.xlu1 %v856_v34, %s995_s24 }
 0x454   : > { %v478_v36 = vpop.permute.xlu1 %477 }
 0x455   : > { %481 = vst.msk [vmem:[%s1125_s5] sm:$0xf] %vm480_vm5, %v478_v36 }
 0x45c   : > { %v597_v37 = vpop.permute.xlu0 %596 }
 0x45d   : > { %600 = vst.msk [vmem:[%s1125_s5] sm:$0xf] %vm599_vm6, %v597_v37 }
 0x489   : > { %v716_v38 = vpop.permute.xlu1 %715 }
 0x48a   : > { %719 = vst.msk [vmem:[%s1125_s5] sm:$0xf] %vm718_vm7, %v716_v38 }
 0x48b PF: > { %s13_s14 = sadd.s32 1, %s991_s14   ;;  %s1147_s12 = smov %s987_s13 }
 0x48c   : > { %p10_p5 = scmp.ge.s32.totalorder %s13_s14, 4   ;;  %s1148_s13 = smov %s1150_s15 }
 0x48e   :  { %12 = sbr.rel (!%p10_p5) target bundleno = 2 (0x2), region = 68 }

// kernel: transformer_decoder_block.15
= control target key start
LH: loop header
LB: loop body
LE: loop exit
PB: predicated region body
PF: predicated region fallthrough
CT: control target
= control target key end

     0   :  { %12 = vsyncpa [#allocation5], 0  ;;  %s1474_s0 = inlined_call_operand.vmem [shape: bf16[16,128], index: 0, kind: input, shape index: {}]   ;;  %s1475_s1 = inlined_call_operand.hbm [shape: bf16[1,128], index: 1, kind: input, shape index: {}]   ;;  %s1476_s2 = inlined_call_operand.hbm [shape: bf16[1,128], index: 2, kind: input, shape index: {}]   ;;  %s1477_s3 = inlined_call_operand.vmem [shape: bf16[128,512], index: 3, kind: input, shape index: {}]   ;;  %s1478_s4 = inlined_call_operand.vmem [shape: bf16[1,512], index: 4, kind: input, shape index: {}]   ;;  %s1479_s5 = inlined_call_operand.vmem [shape: bf16[512,128], index: 5, kind: input, shape index: {}]   ;;  %s1480_s6 = inlined_call_operand.hbm [shape: bf16[1,128], index: 6, kind: input, shape index: {}]   ;;  %s1481_s7 = inlined_call_operand.hbm [shape: bf16[16,128], index: 7, kind: output, shape index: {}]  }
   0x1   :  { %13 = vsyncpa [#allocation8], 0 }
   0x2   :  { %14 = vsyncpa [#allocation6], 0  ;;  %s1145_s24 = smov [#allocation7]   ;;  %s1146_s26 = smov [#allocation4]  }
   0x3   :  { %s33_s25 = sshll.u32 %s1145_s24, 4  ;;  %s23_s27 = sshll.u32 %s1146_s26, 4  ;;  %s34_s25 = int_to_ptr.vmem [resolvable:$true] %s33_s25  ;;  %s24_s27 = int_to_ptr.vmem [resolvable:$true] %s23_s27 }
   0x4   :  { %s1051_s30 = scalar_lea.hbm %s1476_s2, 16 }
   0x5   :  { %p1052_p0 = scmp.ne.s32.totalorder %s1476_s2, %s1051_s30  ;;  %p1055_p1 = scmp.lt.u32.totalorder %s1051_s30, %s1476_s2 }
   0x7   :  { %p1057_p2 = pnand %p1055_p1, %p1052_p0 }
   0x9   :  { %1060 = shalt.err (!%p1057_p2)
}
   0xa   :  { %s1061_s12 = scalar_lea.vmem %s34_s25, 16  ;;  %s1065_s13 = scalar_lea.vmem %s34_s25, 32 }
   0xb   :  { %p1062_p3 = scmp.ne.s32.totalorder %s34_s25, %s1061_s12  ;;  %p1066_p4 = scmp.lt.s32.totalorder %s34_s25, %s34_s25 }
   0xc   :  { %p1067_p5 = scmp.lt.s32.totalorder %s1065_s13, %s1061_s12 }
   0xe   :  { %p1068_p6 = por %p1067_p5, %p1066_p4 }
  0x10   :  { %p1069_p7 = pnand %p1068_p6, %p1062_p3 }
  0x12   :  { %1072 = shalt.err (!%p1069_p7)
}
  0x13   :  { %36 = dma.hbm_to_vmem [thread:$0]  %s1476_s2, 16, %s34_s25, [#allocation8]  }
  0x14   :  { %s1073_s18 = scalar_lea.hbm %s1475_s1, 16 }
  0x15   :  { %p1074_p8 = scmp.ne.s32.totalorder %s1475_s1, %s1073_s18  ;;  %p1077_p9 = scmp.lt.u32.totalorder %s1073_s18, %s1475_s1 }
  0x17   :  { %p1079_p10 = pnand %p1077_p9, %p1074_p8 }
  0x19   :  { %1082 = shalt.err (!%p1079_p10)
}
  0x1a   :  { %s1083_s23 = scalar_lea.vmem %s24_s27, 16  ;;  %s1087_s24 = scalar_lea.vmem %s24_s27, 32 }
  0x1b   :  { %p1084_p11 = scmp.ne.s32.totalorder %s24_s27, %s1083_s23  ;;  %p1088_p12 = scmp.lt.s32.totalorder %s24_s27, %s24_s27 }
  0x1c   :  { %p1089_p13 = scmp.lt.s32.totalorder %s1087_s24, %s1083_s23 }
  0x1e   :  { %p1090_p0 = por %p1089_p13, %p1088_p12 }
  0x20   :  { %p1091_p1 = pnand %p1090_p0, %p1084_p11 }
  0x22   :  { %1094 = shalt.err (!%p1091_p1)
}
  0x23   :  { %26 = dma.hbm_to_vmem [thread:$0]  %s1475_s1, 16, %s24_s27, [#allocation5]  }
  0x24   :  { %s1147_s26 = smov [#allocation9]   ;;  %s1095_s8 = scalar_lea.hbm %s1480_s6, 16 }
  0x25   :  { %s49_s28 = sshll.u32 %s1147_s26, 4  ;;  %p1096_p2 = scmp.ne.s32.totalorder %s1480_s6, %s1095_s8  ;;  %s50_s28 = int_to_ptr.vmem [resolvable:$true] %s49_s28 }
  0x26   :  { %p1099_p3 = scmp.lt.u32.totalorder %s1095_s8, %s1480_s6 }
  0x28   :  { %p1101_p4 = pnand %p1099_p3, %p1096_p2 }
  0x2a   :  { %1104 = shalt.err (!%p1101_p4)
}
  0x2b   :  { %s1105_s13 = scalar_lea.vmem %s50_s28, 16  ;;  %s1109_s1 = scalar_lea.vmem %s50_s28, 32 }
  0x2c   :  { %p1106_p5 = scmp.ne.s32.totalorder %s50_s28, %s1105_s13  ;;  %p1110_p6 = scmp.lt.s32.totalorder %s50_s28, %s50_s28 }
  0x2d   :  { %p1111_p7 = scmp.lt.s32.totalorder %s1109_s1, %s1105_s13 }
  0x2f   :  { %p1112_p8 = por %p1111_p7, %p1110_p6 }
  0x31   :  { %p1113_p9 = pnand %p1112_p8, %p1106_p5 }
  0x33   :  { %1116 = shalt.err (!%p1113_p9)
}
  0x34   :  { %52 = dma.hbm_to_vmem [thread:$0]  %s1480_s6, 16, %s50_s28, [#allocation8]  }
  0x35   :  { %1139 = dma.done.wait [#allocation5], 16  }
  0x36   :  { %1140 = vsyncadd [#allocation5], 4294967280 }
  0x37   :  { %1141 = dma.done.wait [#allocation8], 32  }
  0x38   :  { %1142 = vsyncadd [#allocation8], 4294967264  ;;  %v904_v0 = vld [vmem:[%s1474_s0] sm:$0xff]   ;;  %v969_v4 = vld [vmem:[%s1477_s3 + $0xc] ss:$16 sps:$4 sm:$0xff]   ;;  %v1148_v37 = vmov 0   ;;  %v96_v50 = vlaneseq }
  0x39   :  { %v1231_v1 = vunpack.c.l.bf16 %v904_v0  ;;  %v1234_v2 = vunpack.c.h.bf16 %v904_v0  ;;  %v967_v3 = vld [vmem:[%s1477_s3 + $0x4] ss:$16 sps:$4 sm:$0xff]   ;;  %v971_v5 = vld [vmem:[%s1477_s3] ss:$16 sps:$4 sm:$0xff]   ;;  %v972_v6 = vld [vmem:[%s1477_s3 + $0x8] ss:$16 sps:$4 sm:$0xff]   ;;  %389 = vmatprep.subr.bf16.mxu1 %v969_v4  ;;  %378 = vmatprep.mubr.bf16.mxu0 %v1148_v37 }
  0x3a   :  { %v973_v7 = vld [vmem:[%s1477_s3 + $0x24] ss:$16 sps:$4 sm:$0xff]   ;;  %v975_v8 = vld [vmem:[%s1477_s3 + $0x2c] ss:$16 sps:$4 sm:$0xff]   ;;  %346 = vmatprep.subr.bf16.mxu0 %v967_v3  ;;  %390 = vmatpush1.bf16.msra.mxu1 %v972_v6  ;;  %v977_v17 = vld [vmem:[%s1477_s3 + $0x20] ss:$16 sps:$4 sm:$0xff]  }
  0x3b   :  { %71 = vadd.xlane.f32.xlu0 %v1231_v1  ;;  %347 = vmatpush1.bf16.msra.mxu0 %v971_v5  ;;  %v978_v18 = vld [vmem:[%s1477_s3 + $0x28] ss:$16 sps:$4 sm:$0xff]   ;;  %v979_v19 = vld [vmem:[%s1477_s3 + $0x44] ss:$16 sps:$4 sm:$0xff]   ;;  %v981_v20 = vld [vmem:[%s1477_s3 + $0x4c] ss:$16 sps:$4 sm:$0xff]  }
  0x3c   :  { %348 = vmatprep.subr.bf16.mxu0 %v973_v7  ;;  %391 = vmatprep.subr.bf16.mxu1 %v975_v8  ;;  %v983_v21 = vld [vmem:[%s1477_s3 + $0x40] ss:$16 sps:$4 sm:$0xff]   ;;  %v984_v22 = vld [vmem:[%s1477_s3 + $0x48] ss:$16 sps:$4 sm:$0xff]   ;;  %v985_v23 = vld [vmem:[%s1477_s3 + $0x64] ss:$16 sps:$4 sm:$0xff]  }
  0x3d   :  { %v987_v24 = vld [vmem:[%s1477_s3 + $0x6c] ss:$16 sps:$4 sm:$0xff]   ;;  %v989_v25 = vld [vmem:[%s1477_s3 + $0x60] ss:$16 sps:$4 sm:$0xff]   ;;  %v990_v26 = vld [vmem:[%s1477_s3 + $0x68] ss:$16 sps:$4 sm:$0xff]   ;;  %421 = vmatprep.mubr.bf16.mxu1 %v1148_v37 }
  0x3e   :  { %392 = vmatpush1.bf16.msra.mxu1 %v978_v18  ;;  %v991_v27 = vld [vmem:[%s1477_s3 + $0x84] ss:$16 sps:$4 sm:$0xff]   ;;  %v993_v28 = vld [vmem:[%s1477_s3 + $0x8c] ss:$16 sps:$4 sm:$0xff]   ;;  %v995_v29 = vld [vmem:[%s1477_s3 + $0x80] ss:$16 sps:$4 sm:$0xff]  }
  0x3f   :  { %73 = vadd.xlane.f32.xlu0 %v1234_v2  ;;  %349 = vmatpush1.bf16.msra.mxu0 %v977_v17  ;;  %v996_v30 = vld [vmem:[%s1477_s3 + $0x88] ss:$16 sps:$4 sm:$0xff]   ;;  %v997_v31 = vld [vmem:[%s1477_s3 + $0xa4] ss:$16 sps:$4 sm:$0xff]   ;;  %v999_v32 = vld [vmem:[%s1477_s3 + $0xac] ss:$16 sps:$4 sm:$0xff]  }
  0x40   :  { %350 = vmatprep.subr.bf16.mxu0 %v979_v19  ;;  %393 = vmatprep.subr.bf16.mxu1 %v981_v20  ;;  %v1001_v33 = vld [vmem:[%s1477_s3 + $0xa0] ss:$16 sps:$4 sm:$0xff]   ;;  %v1002_v34 = vld [vmem:[%s1477_s3 + $0xa8] ss:$16 sps:$4 sm:$0xff]   ;;  %v1003_v35 = vld [vmem:[%s1477_s3 + $0xc4] ss:$16 sps:$4 sm:$0xff]  }
  0x41   :  { %v1005_v36 = vld [vmem:[%s1477_s3 + $0xcc] ss:$16 sps:$4 sm:$0xff]   ;;  %v1007_v38 = vld [vmem:[%s1477_s3 + $0xc0] ss:$16 sps:$4 sm:$0xff]   ;;  %v1008_v39 = vld [vmem:[%s1477_s3 + $0xc8] ss:$16 sps:$4 sm:$0xff]  }
  0x42   :  { %394 = vmatpush1.bf16.msra.mxu1 %v984_v22  ;;  %v1009_v40 = vld [vmem:[%s1477_s3 + $0xe4] ss:$16 sps:$4 sm:$0xff]   ;;  %v1011_v41 = vld [vmem:[%s1477_s3 + $0xec] ss:$16 sps:$4 sm:$0xff]   ;;  %v1013_v42 = vld [vmem:[%s1477_s3 + $0xe0] ss:$16 sps:$4 sm:$0xff]  }
  0x43   :  { %351 = vmatpush1.bf16.msra.mxu0 %v983_v21  ;;  %395 = vmatprep.subr.bf16.mxu1 %v987_v24  ;;  %v1014_v43 = vld [vmem:[%s1477_s3 + $0xe8] ss:$16 sps:$4 sm:$0xff]   ;;  %v1015_v44 = vld [vmem:[%s1479_s5 + $0x40] sm:$0xff]   ;;  %v1349_v53 = vshrl.u32 %v96_v50, 7  ;;  %v1026_v17 = vld [vmem:[%s1479_s5 + $0x90] sm:$0xff]  }
  0x44   :  { %352 = vmatprep.subr.bf16.mxu0 %v985_v23  ;;  %v1016_v45 = vld [vmem:[%s1479_s5 + $0xc0] sm:$0xff]   ;;  %v1027_v18 = vld [vmem:[%s1479_s5 + $0x58] sm:$0xff]  }
  0x45   :  { %v94_v54 = vld [vmem:[#allocation4] sm:$0x1]  ;;  %v1352_v56 = vsub.s32 0, %v1349_v53  ;;  %v102_v57 = vld [vmem:[#allocation7] sm:$0x1]  ;;  %v1028_v19 = vld [vmem:[%s1479_s5 + $0xd8] sm:$0xff]  }
  0x46   :  { %396 = vmatpush1.bf16.msra.mxu1 %v990_v26  ;;  %v95_v55 = vunpack.c.l.bf16 %v94_v54  ;;  %v103_v61 = vunpack.c.l.bf16 %v102_v57  ;;  %v1017_v7 = vld [vmem:[%s1479_s5] sm:$0xff]   ;;  %v1029_v20 = vld [vmem:[%s1479_s5 + $0x18] sm:$0xff]   ;;  %v1035_v26 = vld [vmem:[%s1479_s5 + $0x68] sm:$0xff]  }
  0x47   :  { %353 = vmatpush1.bf16.msra.mxu0 %v989_v25  ;;  %397 = vmatprep.subr.bf16.mxu1 %v993_v28  ;;  %v1018_v8 = vld [vmem:[%s1479_s5 + $0x80] sm:$0xff]   ;;  %v1030_v21 = vld [vmem:[%s1479_s5 + $0x98] sm:$0xff]   ;;  %v1037_v28 = vld [vmem:[%s1479_s5 + $0x28] sm:$0xff]  }
  0x48   :  { %354 = vmatprep.subr.bf16.mxu0 %v991_v27  ;;  %v99_v60 = vrot.slane %v95_v55, %v1352_v56  ;;  %v107_v3 = vrot.slane %v103_v61, %v1352_v56  ;;  %v1031_v22 = vld [vmem:[%s1479_s5 + $0x60] sm:$0xff]   ;;  %v1036_v27 = vld [vmem:[%s1479_s5 + $0xe8] sm:$0xff]   ;;  %v1046_v37 = vld [vmem:[%s1479_s5 + $0xb8] sm:$0xff]  }
  0x49   :  { %v1032_v23 = vld [vmem:[%s1479_s5 + $0xe0] sm:$0xff]  }
  0x4a   :  { %398 = vmatpush1.bf16.msra.mxu1 %v996_v30  ;;  %v1033_v24 = vld [vmem:[%s1479_s5 + $0x20] sm:$0xff]   ;;  %v1039_v30 = vld [vmem:[%s1479_s5 + $0x70] sm:$0xff]  }
  0x4b   :  { %355 = vmatpush1.bf16.msra.mxu0 %v995_v29  ;;  %399 = vmatprep.subr.bf16.mxu1 %v999_v32  ;;  %v1034_v25 = vld [vmem:[%s1479_s5 + $0xa0] sm:$0xff]   ;;  %v1038_v29 = vld [vmem:[%s1479_s5 + $0xa8] sm:$0xff]   ;;  %v1041_v32 = vld [vmem:[%s1479_s5 + $0x30] sm:$0xff]  }
  0x4c   :  { %356 = vmatprep.subr.bf16.mxu0 %v997_v31  ;;  %v1040_v31 = vld [vmem:[%s1479_s5 + $0xf0] sm:$0xff]  }
  0x4e   :  { %400 = vmatpush1.bf16.msra.mxu1 %v1002_v34  ;;  %v1043_v34 = vld [vmem:[%s1479_s5 + $0x78] sm:$0xff]  }
  0x4f   :  { %357 = vmatpush1.bf16.msra.mxu0 %v1001_v33  ;;  %401 = vmatprep.subr.bf16.mxu1 %v1005_v36  ;;  %v1042_v33 = vld [vmem:[%s1479_s5 + $0xb0] sm:$0xff]   ;;  %v1045_v36 = vld [vmem:[%s1479_s5 + $0x38] sm:$0xff]  }
  0x50   :  { %358 = vmatprep.subr.bf16.mxu0 %v1003_v35  ;;  %v1044_v35 = vld [vmem:[%s1479_s5 + $0xf8] sm:$0xff]  }
  0x52   :  { %402 = vmatpush1.bf16.msra.mxu1 %v1008_v39 }
  0x53   :  { %359 = vmatpush1.bf16.msra.mxu0 %v1007_v38  ;;  %403 = vmatprep.subr.bf16.mxu1 %v1011_v41  ;;  %v147_v38 = vld [vmem:[%s1478_s4] sm:$0xf]  ;;  %v156_v41 = vsub.s32 2, %v1349_v53  ;;  %s1149_s4 = smov [#allocation10]  }
  0x54   :  { %360 = vmatprep.subr.bf16.mxu0 %v1009_v40  ;;  %v148_v39 = vunpack.c.l.bf16 %v147_v38  ;;  %v160_v40 = vsub.s32 4, %v1349_v53 }
  0x56   :  { %404 = vmatpush1.bf16.msra.mxu1 %v1014_v43  ;;  %v153_v43 = vrot.slane %v148_v39, %v1352_v56 }
  0x57   :  { %361 = vmatpush1.bf16.msra.mxu0 %v1013_v42  ;;  %938 = vmatprep.subr.bf16.mxu1 %v1016_v45  ;;  %v164_v42 = vsub.s32 6, %v1349_v53  ;;  %v157_v45 = vrot.slane %v148_v39, %v156_v41 }
  0x58   :  { %916 = vmatprep.subr.bf16.mxu0 %v1015_v44  ;;  %v161_v44 = vrot.slane %v148_v39, %v160_v40 }
  0xc8   :  { %v72_v9 = vpop.xlane.xlu0 %71 }
  0xc9   :  { %v76_v10 = vmul.f32 0.0078125, %v72_v9 }
  0xcb   :  { %v1256_v11 = vsub.f32 %v1231_v1, %v76_v10  ;;  %v1019_v10 = vld [vmem:[%s1479_s5 + $0x48] sm:$0xff]  }
  0xcc   :  { %v74_v12 = vpop.xlane.xlu0 %73 }
  0xcd   :  { %v77_v13 = vmul.f32 0.0078125, %v74_v12  ;;  %v80_v14 = vmul.f32 %v1256_v11, %v1256_v11  ;;  %v1021_v12 = vld [vmem:[%s1479_s5 + $0x8] sm:$0xff]  }
  0xcf   :  { %v1261_v15 = vsub.f32 %v1234_v2, %v77_v13  ;;  %82 = vadd.xlane.f32.xlu1 %v80_v14  ;;  %v1022_v13 = vld [vmem:[%s1479_s5 + $0x88] sm:$0xff]   ;;  %v1023_v14 = vld [vmem:[%s1479_s5 + $0x50] sm:$0xff]  }
  0xd1   :  { %v81_v16 = vmul.f32 %v1261_v15, %v1261_v15 }
  0xd3   :  { %84 = vadd.xlane.f32.xlu1 %v81_v16  ;;  %v1025_v16 = vld [vmem:[%s1479_s5 + $0x10] sm:$0xff]  }
 0x15c   :  { %v83_v46 = vpop.xlane.xlu1 %82 }
 0x15d   :  { %v86_v47 = vmul.f32 0.0078125, %v83_v46  ;;  %v165_v46 = vrot.slane %v148_v39, %v164_v42 }
 0x15f   :  { %v88_v48 = vadd.f32 1e-05, %v86_v47  ;;  %v173_v47 = vrot.slane %v153_v43, %v1352_v56  ;;  %v185_v50 = vrot.slane %v165_v46, %v1352_v56 }
 0x160   :  { %v85_v49 = vpop.xlane.xlu1 %84 }
 0x161   :  { %1047 = vrsqrt.f32 %v88_v48  ;;  %v87_v51 = vmul.f32 0.0078125, %v85_v49  ;;  %v181_v48 = vrot.slane %v161_v44, %v1352_v56  ;;  %v177_v49 = vrot.slane %v157_v45, %v1352_v56 }
 0x163   :  { %v89_v52 = vadd.f32 1e-05, %v87_v51 }
 0x165   :  { %1049 = vrsqrt.f32 %v89_v52 }
 0x16b   :  { %v1048_v58 = vpop.eup %1047 }
 0x16c   :  { %v92_v59 = vmul.f32 %v1048_v58, %v1256_v11  ;;  %v1020_v11 = vld [vmem:[%s1479_s5 + $0xc8] sm:$0xff]  }
 0x16e   :  { %v100_v0 = vmul.f32 %v99_v60, %v92_v59 }
 0x16f   :  { %v1050_v62 = vpop.eup %1049 }
 0x170   :  { %v93_v63 = vmul.f32 %v1050_v62, %v1261_v15  ;;  %v108_v5 = vadd.f32 %v107_v3, %v100_v0  ;;  %v1024_v15 = vld [vmem:[%s1479_s5 + $0xd0] sm:$0xff]   ;;  %s822_s5 = sshll.u32 %s1149_s4, 4  ;;  %s823_s5 = int_to_ptr.vmem [resolvable:$true] %s822_s5 }
 0x171   :  { %s1117_s11 = scalar_lea.vmem %s823_s5, 128  ;;  %p1122_p11 = scmp.lt.s32.totalorder %s823_s5, %s823_s5 }
 0x172   :  { %v101_v4 = vmul.f32 %v99_v60, %v93_v63  ;;  %p1118_p10 = scmp.ne.s32.totalorder %s823_s5, %s1117_s11  ;;  %p1123_p12 = scmp.lt.s32.totalorder %s1117_s11, %s1117_s11 }
 0x174   :  { %v109_v6 = vadd.f32 %v107_v3, %v101_v4  ;;  %p1124_p13 = por %p1123_p12, %p1122_p11 }
 0x176   :  { %v110_v9 = vpack.c.bf16 %v109_v6, %v108_v5  ;;  %p1125_p0 = pnand %p1124_p13, %p1118_p10 }
 0x178   :  { %379 = vmatmul.mubr.bf16.vlgmr.msra.gmra.mrb[0].mxu0 %v110_v9  ;;  %422 = vmatmul.mubr.bf16.vlgmr.msra.gmra.mrb[0].mxu1 %v110_v9 }
 0x179   :  { %917 = vmatpush3.bf16.msra.mxu0 %v1017_v7  ;;  %939 = vmatpush3.bf16.msra.mxu1 %v1018_v8 }
 0x17a   :  { %918 = vmatprep.subr.bf16.mxu0 %v1019_v10  ;;  %940 = vmatprep.subr.bf16.mxu1 %v1020_v11 }
 0x17d   :  { %919 = vmatpush3.bf16.msra.mxu0 %v1021_v12  ;;  %941 = vmatpush3.bf16.msra.mxu1 %v1022_v13 }
 0x17e   :  { %920 = vmatprep.subr.bf16.mxu0 %v1023_v14  ;;  %942 = vmatprep.subr.bf16.mxu1 %v1024_v15 }
 0x181   :  { %921 = vmatpush3.bf16.msra.mxu0 %v1025_v16  ;;  %943 = vmatpush3.bf16.msra.mxu1 %v1026_v17 }
 0x182   :  { %922 = vmatprep.subr.bf16.mxu0 %v1027_v18  ;;  %944 = vmatprep.subr.bf16.mxu1 %v1028_v19  ;;  %v793_v18 = vld [vmem:[#allocation9] sm:$0x1] }
 0x183   :  { %v794_v19 = vunpack.c.l.bf16 %v793_v18 }
 0x185   :  { %923 = vmatpush3.bf16.msra.mxu0 %v1029_v20  ;;  %945 = vmatpush3.bf16.msra.mxu1 %v1030_v21 }
 0x186   :  { %924 = vmatprep.subr.bf16.mxu0 %v1031_v22  ;;  %946 = vmatprep.subr.bf16.mxu1 %v1032_v23 }
 0x189   :  { %925 = vmatpush3.bf16.msra.mxu0 %v1033_v24  ;;  %947 = vmatpush3.bf16.msra.mxu1 %v1034_v25 }
 0x18a   :  { %926 = vmatprep.subr.bf16.mxu0 %v1035_v26  ;;  %948 = vmatprep.subr.bf16.mxu1 %v1036_v27  ;;  %v798_v26 = vrot.slane %v794_v19, %v1352_v56 }
 0x18d   :  { %927 = vmatpush3.bf16.msra.mxu0 %v1037_v28  ;;  %949 = vmatpush3.bf16.msra.mxu1 %v1038_v29 }
 0x18e   :  { %928 = vmatprep.subr.bf16.mxu0 %v1039_v30  ;;  %950 = vmatprep.subr.bf16.mxu1 %v1040_v31 }
 0x191   :  { %929 = vmatpush3.bf16.msra.mxu0 %v1041_v32  ;;  %951 = vmatpush3.bf16.msra.mxu1 %v1042_v33 }
 0x192   :  { %930 = vmatprep.subr.bf16.mxu0 %v1043_v34  ;;  %952 = vmatprep.subr.bf16.mxu1 %v1044_v35 }
 0x195   :  { %931 = vmatpush3.bf16.msra.mxu0 %v1045_v36  ;;  %953 = vmatpush3.bf16.msra.mxu1 %v1046_v37 }
 0x24b   :  { %v380_v51 = vpop.f32.mrb[0].mxu0  ;;  %v423_v52 = vpop.f32.mrb[0].mxu1 }
 0x24c   :  { %v381_v54 = vadd.f32 %v380_v51, %v173_v47  ;;  %v424_v55 = vadd.f32 %v423_v52, %v181_v48  ;;  %v382_v57 = vpop.f32.mrb[1].mxu0  ;;  %v425_v58 = vpop.f32.mrb[1].mxu1 }
 0x24d   :  { %v383_v53 = vadd.f32 %v382_v57, %v177_v49  ;;  %v426_v59 = vadd.f32 %v425_v58, %v185_v50  ;;  %v384_v60 = vpop.f32.mrb[2].mxu0  ;;  %v427_v61 = vpop.f32.mrb[2].mxu1 }
 0x24e   :  { %v385_v62 = vadd.f32 %v384_v60, %v173_v47  ;;  %v428_v63 = vadd.f32 %v427_v61, %v181_v48  ;;  %v386_v0 = vpop.f32.mrb[3].mxu0  ;;  %v429_v3 = vpop.f32.mrb[3].mxu1  ;;  %v432_v6 = vmax.f32 %v381_v54, 0.0  ;;  %v434_v7 = vmax.f32 %v424_v55, 0.0 }
 0x24f   :  { %v387_v4 = vadd.f32 %v386_v0, %v177_v49  ;;  %v430_v5 = vadd.f32 %v429_v3, %v185_v50  ;;  %v433_v10 = vmax.f32 %v383_v53, 0.0  ;;  %v435_v11 = vmax.f32 %v426_v59, 0.0 }
 0x250   :  { %v436_v8 = vmax.f32 %v385_v62, 0.0  ;;  %v438_v9 = vmax.f32 %v428_v63, 0.0 }
 0x251   :  { %v437_v12 = vmax.f32 %v387_v4, 0.0  ;;  %v439_v13 = vmax.f32 %v430_v5, 0.0 }
 0x252   :  { %v442_v14 = vpack.c.bf16 %v436_v8, %v432_v6  ;;  %v444_v15 = vpack.c.bf16 %v438_v9, %v434_v7 }
 0x253   :  { %v443_v16 = vpack.c.bf16 %v437_v12, %v433_v10  ;;  %v445_v17 = vpack.c.bf16 %v439_v13, %v435_v11 }
 0x255   :  { %734 = vmatprep.mubr.bf16.mxu0 %v443_v16  ;;  %775 = vmatprep.mubr.bf16.mxu1 %v445_v17 }
 0x256   :  { %735 = vmatmul.mubr.bf16.vlgmr.msra.gmra.mrb[4].mxu0 %v442_v14  ;;  %776 = vmatmul.mubr.bf16.vlgmr.msra.gmra.mrb[4].mxu1 %v444_v15 }
 0x329   :  { %v932_v20 = vpop.f32.mrb[4].mxu0  ;;  %v954_v21 = vpop.f32.mrb[4].mxu1 }
 0x32a   :  { %v933_v22 = vpop.f32.mrb[5].mxu0  ;;  %v955_v23 = vpop.f32.mrb[5].mxu1 }
 0x32b   :  { %v934_v24 = vadd.f32 %v933_v22, %v932_v20  ;;  %v956_v25 = vadd.f32 %v955_v23, %v954_v21  ;;  %v935_v27 = vpop.f32.mrb[6].mxu0  ;;  %v957_v28 = vpop.f32.mrb[6].mxu1 }
 0x32c   :  { %v936_v29 = vpop.f32.mrb[7].mxu0  ;;  %v958_v30 = vpop.f32.mrb[7].mxu1 }
 0x32d   :  { %v778_v31 = vadd.f32 %v956_v25, %v934_v24  ;;  %v937_v32 = vadd.f32 %v936_v29, %v935_v27  ;;  %v959_v33 = vadd.f32 %v958_v30, %v957_v28 }
 0x32f   :  { %v799_v34 = vadd.f32 %v798_v26, %v778_v31  ;;  %v781_v35 = vadd.f32 %v959_v33, %v937_v32 }
 0x331   :  { %v800_v36 = vadd.f32 %v798_v26, %v781_v35  ;;  %v805_v37 = vadd.f32 %v1231_v1, %v799_v34 }
 0x333   :  { %v806_v38 = vadd.f32 %v1234_v2, %v800_v36 }
 0x335   :  { %v914_v39 = vpack.c.bf16 %v806_v38, %v805_v37 }
 0x337   :  { %915 = vst [vmem:[#allocation10] sm:$0xff] %v914_v39  }
 0x338   :  { %1128 = shalt.err (!%p1125_p0)
}
 0x339   :  { %s1129_s1 = scalar_lea.hbm %s1481_s7, 128 }
 0x33a   :  { %p1130_p1 = scmp.ne.s32.totalorder %s1481_s7, %s1129_s1  ;;  %p1133_p2 = scmp.lt.u32.totalorder %s1129_s1, %s1481_s7 }
 0x33c   :  { %p1135_p3 = pnand %p1133_p2, %p1130_p1 }
 0x33e   :  { %1138 = shalt.err (!%p1135_p3)
}
 0x33f   :  { %s1150_s17 = smov 64   ;;  %s1151_s18 = smov 4  }
 0x340   :  { %828 = dma.vmem_to_hbm [thread:$0]  %s823_s5, 128, %s1481_s7, [#allocation6], %s1150_s17, %s1150_s17, %s1151_s18  }
 0x341   :  { %1143 = dma.done.wait [#allocation6], 128  }
 0x342   :  { %1144 = vsyncadd [#allocation6], 4294967168 }
 0x343   :  { %832 = vsyncpa [#allocation5], 1 }
 0x344   :  { %833 = vsyncpa [#allocation8], 1 }
 0x345   :  { %834 = vsyncpa [#allocation6], 1 }

</bundles_post_ra>
